<compile_context>
chip_gen: v6e
topology: v6e:2x2x1
jax: 0.10.0
libtpu: 0.0.40
codegen_flags: <defaults>
</compile_context>

<pallas_src>
import jax
import jax.numpy as jnp
from jax import lax
from jax.experimental import pallas as pl
from jax.experimental.pallas import tpu as pltpu


SEQ_LEN = 6        # fixed by the module (view(6, 1, -1))
NUM_CLASSES = 6    # one-hot width and the final view(-1, 6)
LANE = 128         # per-gate lane padding (one vreg lane width)
NUM_GATES = 4      # LSTM gates i, f, g, o (PyTorch order)
BATCH_TILE = 8     # sequences per grid step (one sublane each)

# --- gate slab layout: (2*LANE, 4*LANE) -------------------------------------
WX_ROW = 0                    # rows 0..5     : W_ih token rows + (b_ih + b_hh)
WHH_ROW = LANE                # rows 128..133 : W_hh rows (h index = row - 128)

# --- mlp slab layout: (MLP_SLAB_ROWS, LANE) ---------------------------------
W1_ROW = 0                    # rows 0..5     : out_11.weight^T (lanes 0..H-1)
B1_ROW = LANE                 # row 128       : out_11.bias
B2_ROW = LANE + 1             # row 129       : out_12.bias
W2_ROW = LANE + 8             # rows 136..    : out_12.weight^T (rows 0..H-1)
MLP_SLAB_ROWS = W2_ROW + LANE


def _decoder_kernel(onehot_ref, state_ref, gate_ref, mlp_ref, out_ref,
                    gx_scr, hseq_scr):
    """One batch tile (8 sequences) per grid step; everything resident in VMEM.

    onehot_ref: VMEM (48, 128)  one-hot tokens, row = t*8 + b, classes in lanes 0..5
    state_ref:  VMEM (8, 256)   lanes 0..127 = h0, lanes 128..255 = c0
    gate_ref:   VMEM (256, 512) rows 0..127 token projection (+bias), 128..255 Whh
    mlp_ref:    VMEM (264, 128) packed Linear weights / biases
    out_ref:    VMEM (64, 128)  rows 0..47 log-probs (t*8+b), 48..55 h_n, 56..63 c_n
    gx_scr:     VMEM (48, 512)  hoisted input-projection staging
    hseq_scr:   VMEM (48, 128)  per-step h_t rows
    """
    P, O, BT = LANE, NUM_CLASSES, BATCH_TILE

    # Hoisted input projection: one MXU matmul covering every (t, b) row, so the
    # 6-step serial h->h chain below only contains dot(h, Whh) + nonlinearities.
    # The LSTM bias is already folded into the token rows of gate_ref.
    gx_scr[...] = jnp.dot(onehot_ref[...], gate_ref[WX_ROW:WX_ROW + P, :],
                          preferred_element_type=jnp.float32)

    whh = gate_ref.at[WHH_ROW:WHH_ROW + P, :]        # (128, 512) view, rows >= 6 are 0

    # Enforce the pad-lane invariant on entry (lanes >= O of h/c must be 0 so the
    # sigmoid(0)=0.5 feedback on padded lanes of c can never drift).
    lane_b = lax.broadcasted_iota(jnp.int32, (BT, P), 1)
    h = jnp.where(lane_b < O, state_ref[:, 0:P], 0.0)          # (8, 128)
    c = jnp.where(lane_b < O, state_ref[:, P:2 * P], 0.0)      # (8, 128)

    for t in range(SEQ_LEN):                         # statically unrolled recurrence
        r0 = t * BT
        g = gx_scr[r0:r0 + BT, :] + jnp.dot(h, whh[...],
                                            preferred_element_type=jnp.float32)
        # 128-aligned gate slices -> whole-vreg views, no lane shuffles.
        i_g = jax.nn.sigmoid(g[:, 0 * P:1 * P])
        f_g = jax.nn.sigmoid(g[:, 1 * P:2 * P])
        g_g = jnp.tanh(g[:, 2 * P:3 * P])
        o_g = jax.nn.sigmoid(g[:, 3 * P:4 * P])
        c = f_g * c + i_g * g_g                      # padded lanes stay exactly 0
        h = o_g * jnp.tanh(c)
        hseq_scr[r0:r0 + BT, :] = h                  # aligned row store, off the chain

    # Dropout(p=0.2) is identity in inference mode.
    # TODO(synk): training-mode dropout (pltpu.prng_* + mask) not implemented.

    hs = hseq_scr[...]                                            # (48, 128)
    z1 = jnp.dot(hs, mlp_ref[W1_ROW:W1_ROW + P, :],
                 preferred_element_type=jnp.float32) + mlp_ref[B1_ROW:B1_ROW + 1, :]
    z1 = jnp.maximum(z1, 0.0)
    z2 = jnp.dot(z1, mlp_ref[W2_ROW:W2_ROW + P, :],
                 preferred_element_type=jnp.float32) + mlp_ref[B2_ROW:B2_ROW + 1, :]
    z2 = jnp.maximum(z2, 0.0)                                     # (48, 128)

    # view(-1, 6) is the identity row mapping for output_size == 6 (asserted at
    # pack time), so log-softmax is taken directly over the 6 valid lanes.
    lane = lax.broadcasted_iota(jnp.int32, z2.shape, 1)
    neg = jnp.float32(-1e30)
    m = jnp.max(jnp.where(lane < O, z2, neg), axis=-1, keepdims=True)
    e = jnp.where(lane < O, jnp.exp(z2 - m), 0.0)
    logp = z2 - m - jnp.log(jnp.sum(e, axis=-1, keepdims=True))

    # Three aligned, lane-dense stores compose the (64, 128) output tile.
    out_ref[0:SEQ_LEN * BT, :] = logp
    out_ref[SEQ_LEN * BT:(SEQ_LEN + 1) * BT, :] = h
    out_ref[(SEQ_LEN + 1) * BT:(SEQ_LEN + 2) * BT, :] = c


# ---------------------------------------------------------------------------
# One-time parameter packing (run outside the jitted forward).
# ---------------------------------------------------------------------------

def _pack_gate_slab(w_ih, w_hh, b_ih, b_hh):
    """Pack LSTM weights; each gate gets its own 128-lane block, K padded to 128."""
    O = w_hh.shape[1]
    I = w_ih.shape[1]
    P = LANE

    def per_gate_pad(x):                               # (4*O, K) -> (K, 4*P)
        r = x.reshape(NUM_GATES, O, x.shape[-1]).transpose(2, 0, 1)  # (K, 4, O)
        r = jnp.pad(r, ((0, 0), (0, 0), (0, P - O)))
        return r.reshape(x.shape[-1], NUM_GATES * P)

    wx = per_gate_pad(jnp.asarray(w_ih, jnp.float32))  # (I, 4P): row = token id
    whh = per_gate_pad(jnp.asarray(w_hh, jnp.float32)) # (O, 4P): row = h index
    bias = jnp.pad((jnp.asarray(b_ih, jnp.float32) +
                    jnp.asarray(b_hh, jnp.float32)).reshape(NUM_GATES, O),
                   ((0, 0), (0, P - O))).reshape(1, NUM_GATES * P)

    slab = jnp.zeros((2 * P, NUM_GATES * P), jnp.float32)
    slab = slab.at[WX_ROW:WX_ROW + I, :].set(wx + bias)   # bias folded per token row
    slab = slab.at[WHH_ROW:WHH_ROW + O, :].set(whh)       # rows >= O stay zero
    return slab


def _pack_mlp_slab(w1, b1, w2, b2):
    """Pack the two Linear layers into one lane-dense slab (contractions -> 128)."""
    H, O = w1.shape
    slab = jnp.zeros((MLP_SLAB_ROWS, LANE), jnp.float32)
    slab = slab.at[W1_ROW:W1_ROW + O, 0:H].set(jnp.asarray(w1, jnp.float32).T)
    slab = slab.at[B1_ROW, 0:H].set(jnp.asarray(b1, jnp.float32))
    slab = slab.at[B2_ROW, 0:O].set(jnp.asarray(b2, jnp.float32))
    slab = slab.at[W2_ROW:W2_ROW + H, 0:O].set(jnp.asarray(w2, jnp.float32).T)
    return slab


def pack_decoder_params(params):
    """One-time prep: pack PyTorch-layout weights into TPU slabs (outside jit)."""
    O = params["w_hh"].shape[1]
    I = params["w_ih"].shape[1]
    H = params["w1"].shape[0]
    assert I == NUM_CLASSES, "LSTM input_size must equal the one-hot width (6)"
    # view(-1, 6) maps rows to timesteps only when output_size == 6.
    # TODO(synk): general output_size needs the row-regrouping reshape.
    assert O == NUM_CLASSES, "kernel assumes output_size == 6"
    assert H <= LANE, "hidden_size must fit in one 128-lane block"
    return dict(
        gate_slab=_pack_gate_slab(params["w_ih"], params["w_hh"],
                                  params["b_ih"], params["b_hh"]),
        mlp_slab=_pack_mlp_slab(params["w1"], params["b1"],
                                params["w2"], params["b2"]),
    )


# ---------------------------------------------------------------------------
# Forward pass.
# ---------------------------------------------------------------------------

@jax.jit
def revised_decoder_forward_batched(packed, token_ids, h0, c0):
    """token_ids: (B, 6) int ids in [0, 6); h0, c0: (B, output_size)."""
    B = token_ids.shape[0]
    O = h0.shape[-1]
    assert token_ids.shape == (B, SEQ_LEN)
    assert O == NUM_CLASSES and h0.shape == c0.shape == (B, O)

    G = -(-B // BATCH_TILE)            # batch tiles; >= 2 for B > 8 (v7x: both TCs)
    B_pad = G * BATCH_TILE

    # One-hot encode (exactly F.one_hot(num_classes=6)), pad classes to a full
    # 128-lane block, and lay rows out time-major within each batch tile
    # (row = t*8 + b) so each step's gx slice is a contiguous aligned block.
    # Out-of-range ids produce an all-zero row (no in-kernel OOB gather anymore).
    ids = jnp.pad(token_ids.astype(jnp.int32), ((0, B_pad - B), (0, 0)))
    oh = jax.nn.one_hot(ids, NUM_CLASSES, dtype=jnp.float32)          # (B_pad, 6, 6)
    oh = jnp.pad(oh, ((0, 0), (0, 0), (0, LANE - NUM_CLASSES)))       # (B_pad, 6, 128)
    oh = oh.reshape(G, BATCH_TILE, SEQ_LEN, LANE).transpose(0, 2, 1, 3)
    oh = oh.reshape(G * SEQ_LEN * BATCH_TILE, LANE)

    state0 = jnp.zeros((B_pad, 2 * LANE), jnp.float32)                # pad lanes = 0
    state0 = state0.at[:B, 0:O].set(h0.astype(jnp.float32))
    state0 = state0.at[:B, LANE:LANE + O].set(c0.astype(jnp.float32))

    grid_spec = pltpu.PrefetchScalarGridSpec(
        num_scalar_prefetch=0,
        grid=(G,),
        in_specs=[
            pl.BlockSpec((SEQ_LEN * BATCH_TILE, LANE), lambda g: (g, 0)),
            pl.BlockSpec((BATCH_TILE, 2 * LANE), lambda g: (g, 0)),
            # Constant index_map: each weight slab is DMA'd to VMEM once for the
            # whole batch (default buffering kept; total VMEM ~1.5 MiB).
            pl.BlockSpec((2 * LANE, NUM_GATES * LANE), lambda g: (0, 0)),
            pl.BlockSpec((MLP_SLAB_ROWS, LANE), lambda g: (0, 0)),
        ],
        out_specs=pl.BlockSpec((8 * BATCH_TILE, LANE), lambda g: (g, 0)),
        scratch_shapes=[
            pltpu.VMEM((SEQ_LEN * BATCH_TILE, NUM_GATES * LANE), jnp.float32),
            pltpu.VMEM((SEQ_LEN * BATCH_TILE, LANE), jnp.float32),
        ],
    )

    packed_out = pl.pallas_call(
        _decoder_kernel,
        out_shape=jax.ShapeDtypeStruct((G * 8 * BATCH_TILE, LANE), jnp.float32),
        grid_spec=grid_spec,
        compiler_params=pltpu.CompilerParams(
            dimension_semantics=("parallel",)),
    )(oh, state0, packed["gate_slab"], packed["mlp_slab"])

    tile = packed_out.reshape(G, 8 * BATCH_TILE, LANE)
    lp = tile[:, :SEQ_LEN * BATCH_TILE, :].reshape(G, SEQ_LEN, BATCH_TILE, LANE)
    lp = lp.transpose(0, 2, 1, 3).reshape(B_pad, SEQ_LEN, LANE)[:B, :, :NUM_CLASSES]
    hn = tile[:, SEQ_LEN * BATCH_TILE:(SEQ_LEN + 1) * BATCH_TILE, :]
    hn = hn.reshape(B_pad, LANE)[:B, :O]
    cn = tile[:, (SEQ_LEN + 1) * BATCH_TILE:, :].reshape(B_pad, LANE)[:B, :O]
    return lp, (hn, cn)


def revised_decoder_forward(packed, token_ids, hn, cn):
    """Module-parity wrapper: token_ids (6,), hn/cn (1, 1, output_size)."""
    O = hn.shape[-1]
    lp, (h_new, c_new) = revised_decoder_forward_batched(
        packed, token_ids.reshape(1, SEQ_LEN),
        hn.reshape(1, O), cn.reshape(1, O))
    return lp[0], (h_new.reshape(1, 1, O), c_new.reshape(1, 1, O))


def init_params(key, input_size, hidden_size, output_size):
    """Deterministic parameter init mimicking PyTorch default shapes."""
    O, H, I = output_size, hidden_size, input_size
    ks = jax.random.split(key, 10)
    s_lstm = 1.0 / jnp.sqrt(jnp.float32(O))
    s1 = 1.0 / jnp.sqrt(jnp.float32(O))
    s2 = 1.0 / jnp.sqrt(jnp.float32(H))
    u = lambda k, shape, s: jax.random.uniform(
        k, shape, dtype=jnp.float32, minval=-s, maxval=s)
    return dict(
        w_ih=u(ks[0], (4 * O, I), s_lstm),
        w_hh=u(ks[1], (4 * O, O), s_lstm),
        b_ih=u(ks[2], (4 * O,), s_lstm),
        b_hh=u(ks[3], (4 * O,), s_lstm),
        w1=u(ks[4], (H, O), s1),
        b1=u(ks[5], (H,), s1),
        w2=u(ks[6], (O, H), s2),
        b2=u(ks[7], (O,), s2),
    )


def _reference_forward(params, token_ids, hn, cn):
    """Pure-JAX reference (mirrors PyTorch semantics) for one sequence."""
    O = hn.shape[-1]
    x = jax.nn.one_hot(token_ids.astype(jnp.int32), 6,
                       dtype=jnp.float32).reshape(SEQ_LEN, -1)
    h = hn.reshape(1, O)
    c = cn.reshape(1, O)
    b = params["b_ih"] + params["b_hh"]
    hs = []
    for t in range(SEQ_LEN):
        g = x[t:t + 1] @ params["w_ih"].T + h @ params["w_hh"].T + b
        i_g = jax.nn.sigmoid(g[:, 0 * O:1 * O])
        f_g = jax.nn.sigmoid(g[:, 1 * O:2 * O])
        g_g = jnp.tanh(g[:, 2 * O:3 * O])
        o_g = jax.nn.sigmoid(g[:, 3 * O:4 * O])
        c = f_g * c + i_g * g_g
        h = o_g * jnp.tanh(c)
        hs.append(h)
    hseq = jnp.concatenate(hs, axis=0)
    z1 = jax.nn.relu(hseq @ params["w1"].T + params["b1"])
    z2 = jax.nn.relu(z1 @ params["w2"].T + params["b2"])
    out = jax.nn.log_softmax(z2.reshape(-1, 6), axis=-1)
    return out, (h.reshape(1, 1, O), c.reshape(1, 1, O))


if __name__ == "__main__":
    input_size = 6      # must be 6: LSTM consumes the 6-wide one-hot
    hidden_size = 32
    output_size = 6     # LSTM hidden size == output_size in this module
    batch = 16          # 2 batch tiles of 8 -> grid of 2 parallel steps

    key = jax.random.PRNGKey(0)
    k_param, k_tok, k_h, k_c = jax.random.split(key, 4)

    params = init_params(k_param, input_size, hidden_size, output_size)
    packed = pack_decoder_params(params)    # one-time prep, outside the jit

    token_ids = jax.random.randint(k_tok, (batch, SEQ_LEN), 0, NUM_CLASSES,
                                   dtype=jnp.int32)
    h0 = 0.1 * jax.random.normal(k_h, (batch, output_size), jnp.float32)
    c0 = 0.1 * jax.random.normal(k_c, (batch, output_size), jnp.float32)

    out, (hn, cn) = revised_decoder_forward_batched(packed, token_ids, h0, c0)
    jax.block_until_ready((out, hn, cn))

    for b in range(batch):
        r_out, (r_hn, r_cn) = _reference_forward(
            params, token_ids[b],
            h0[b].reshape(1, 1, -1), c0[b].reshape(1, 1, -1))
        assert jnp.allclose(out[b], r_out, atol=5e-5, rtol=5e-5), f"out mismatch b={b}"
        assert jnp.allclose(hn[b], r_hn.reshape(-1), atol=5e-5, rtol=5e-5), f"hn mismatch b={b}"
        assert jnp.allclose(cn[b], r_cn.reshape(-1), atol=5e-5, rtol=5e-5), f"cn mismatch b={b}"

    # Module-parity (batch=1) entry point.
    lp1, (hn1, cn1) = revised_decoder_forward(
        packed, token_ids[0], h0[0].reshape(1, 1, -1), c0[0].reshape(1, 1, -1))
    jax.block_until_ready((lp1, hn1, cn1))

    print("KERNEL_OK")
</pallas_src>

<mosaic_0001>
module attributes {stable_mosaic.version = 11 : i64} {
  func.func @_decoder_kernel(%arg0: i32, %arg1: memref<48x128xf32, #tpu.memory_space<vmem>>, %arg2: memref<8x256xf32, #tpu.memory_space<vmem>>, %arg3: memref<256x512xf32, #tpu.memory_space<vmem>>, %arg4: memref<264x128xf32, #tpu.memory_space<vmem>>, %arg5: memref<64x128xf32, #tpu.memory_space<vmem>>, %arg6: memref<48x512xf32, #tpu.memory_space<vmem>>, %arg7: memref<48x128xf32, #tpu.memory_space<vmem>>) attributes {dimension_semantics = [#tpu.dimension_semantics<parallel>], iteration_bounds = array<i64: 2>, scalar_prefetch = 0 : i64, scratch_operands = 2 : i64, tpu.core_type = #tpu.core_type<tc>, window_params = [{transform_indices = @transform_0, window_bounds = array<i64: 48, 128>}, {transform_indices = @transform_1, window_bounds = array<i64: 8, 256>}, {pipeline_mode = #tpu.pipeline_mode<synchronous>, transform_indices = @transform_2, window_bounds = array<i64: 256, 512>}, {pipeline_mode = #tpu.pipeline_mode<synchronous>, transform_indices = @transform_3, window_bounds = array<i64: 264, 128>}, {transform_indices = @transform_4, window_bounds = array<i64: 64, 128>}]} {
    %c0 = arith.constant 0 : index
    %c0_0 = arith.constant 0 : index
    %0 = vector.load %arg1[%c0, %c0_0] : memref<48x128xf32, #tpu.memory_space<vmem>>, vector<48x128xf32>
    %c0_1 = arith.constant 0 : index
    %c0_2 = arith.constant 0 : index
    %1 = vector.load %arg3[%c0_1, %c0_2] : memref<256x512xf32, #tpu.memory_space<vmem>>, vector<128x512xf32>
    %cst = arith.constant dense<0.000000e+00> : vector<48x512xf32>
    %2 = tpu.matmul %0, %1, %cst {dimension_numbers = #tpu.dot_dimension_numbers<[1], [0], [0], [1], [0, 0, 1, 1], [], []>} : vector<48x128xf32>, vector<128x512xf32>, vector<48x512xf32> -> vector<48x512xf32>
    %c0_3 = arith.constant 0 : index
    %c0_4 = arith.constant 0 : index
    %3 = vector.load %arg6[%c0_3, %c0_4] : memref<48x512xf32, #tpu.memory_space<vmem>>, vector<48x512xf32>
    tpu.vector_store %arg6[%c0_3, %c0_4], %2 {strides = array<i32>} : memref<48x512xf32, #tpu.memory_space<vmem>>, vector<48x512xf32>,
    %4 = tpu.iota {dimensions = array<i32: 1>} : vector<8x128xi32>
    %c6_i32 = arith.constant 6 : i32
    %5 = vector.broadcast %c6_i32 : i32 to vector<8x128xi32>
    %6 = arith.cmpi slt, %4, %5 : vector<8x128xi32>
    %c0_5 = arith.constant 0 : index
    %c0_6 = arith.constant 0 : index
    %7 = vector.load %arg2[%c0_5, %c0_6] : memref<8x256xf32, #tpu.memory_space<vmem>>, vector<8x128xf32>
    %cst_7 = arith.constant 0.000000e+00 : f32
    %8 = vector.broadcast %cst_7 : f32 to vector<8x128xf32>
    %9 = arith.select %6, %7, %8 : vector<8x128xi1>, vector<8x128xf32>
    %c6_i32_8 = arith.constant 6 : i32
    %10 = vector.broadcast %c6_i32_8 : i32 to vector<8x128xi32>
    %11 = arith.cmpi slt, %4, %10 : vector<8x128xi32>
    %c0_9 = arith.constant 0 : index
    %c128 = arith.constant 128 : index
    %12 = vector.load %arg2[%c0_9, %c128] : memref<8x256xf32, #tpu.memory_space<vmem>>, vector<8x128xf32>
    %cst_10 = arith.constant 0.000000e+00 : f32
    %13 = vector.broadcast %cst_10 : f32 to vector<8x128xf32>
    %14 = arith.select %11, %12, %13 : vector<8x128xi1>, vector<8x128xf32>
    %c0_11 = arith.constant 0 : index
    %c0_12 = arith.constant 0 : index
    %15 = vector.load %arg6[%c0_11, %c0_12] : memref<48x512xf32, #tpu.memory_space<vmem>>, vector<8x512xf32>
    %c128_13 = arith.constant 128 : index
    %c0_14 = arith.constant 0 : index
    %16 = vector.load %arg3[%c128_13, %c0_14] : memref<256x512xf32, #tpu.memory_space<vmem>>, vector<128x512xf32>
    %cst_15 = arith.constant dense<0.000000e+00> : vector<8x512xf32>
    %17 = tpu.matmul %9, %16, %cst_15 {dimension_numbers = #tpu.dot_dimension_numbers<[1], [0], [0], [1], [0, 0, 1, 1], [], []>} : vector<8x128xf32>, vector<128x512xf32>, vector<8x512xf32> -> vector<8x512xf32>
    %18 = arith.addf %15, %17 : vector<8x512xf32>
    %19 = vector.extract_strided_slice %18 {offsets = [0, 0], sizes = [8, 128], strides = [1, 1]} : vector<8x512xf32> to vector<8x128xf32>
    %20 = arith.negf %19 : vector<8x128xf32>
    %21 = math.exp %20 : vector<8x128xf32>
    %cst_16 = arith.constant 1.000000e+00 : f32
    %22 = vector.broadcast %cst_16 : f32 to vector<8x128xf32>
    %23 = arith.addf %22, %21 : vector<8x128xf32>
    %24 = arith.divf %22, %23 : vector<8x128xf32>
    %25 = vector.extract_strided_slice %18 {offsets = [0, 128], sizes = [8, 128], strides = [1, 1]} : vector<8x512xf32> to vector<8x128xf32>
    %26 = arith.negf %25 : vector<8x128xf32>
    %27 = math.exp %26 : vector<8x128xf32>
    %cst_17 = arith.constant 1.000000e+00 : f32
    %28 = vector.broadcast %cst_17 : f32 to vector<8x128xf32>
    %29 = arith.addf %28, %27 : vector<8x128xf32>
    %30 = arith.divf %28, %29 : vector<8x128xf32>
    %31 = vector.extract_strided_slice %18 {offsets = [0, 256], sizes = [8, 128], strides = [1, 1]} : vector<8x512xf32> to vector<8x128xf32>
    %32 = math.tanh %31 : vector<8x128xf32>
    %33 = vector.extract_strided_slice %18 {offsets = [0, 384], sizes = [8, 128], strides = [1, 1]} : vector<8x512xf32> to vector<8x128xf32>
    %34 = arith.negf %33 : vector<8x128xf32>
    %35 = math.exp %34 : vector<8x128xf32>
    %cst_18 = arith.constant 1.000000e+00 : f32
    %36 = vector.broadcast %cst_18 : f32 to vector<8x128xf32>
    %37 = arith.addf %36, %35 : vector<8x128xf32>
    %38 = arith.divf %36, %37 : vector<8x128xf32>
    %39 = arith.mulf %30, %14 : vector<8x128xf32>
    %40 = arith.mulf %24, %32 : vector<8x128xf32>
    %41 = arith.addf %39, %40 : vector<8x128xf32>
    %42 = math.tanh %41 : vector<8x128xf32>
    %43 = arith.mulf %38, %42 : vector<8x128xf32>
    %c0_19 = arith.constant 0 : index
    %c0_20 = arith.constant 0 : index
    %44 = vector.load %arg7[%c0_19, %c0_20] : memref<48x128xf32, #tpu.memory_space<vmem>>, vector<8x128xf32>
    tpu.vector_store %arg7[%c0_19, %c0_20], %43 {strides = array<i32>} : memref<48x128xf32, #tpu.memory_space<vmem>>, vector<8x128xf32>,
    %c8 = arith.constant 8 : index
    %c0_21 = arith.constant 0 : index
    %45 = vector.load %arg6[%c8, %c0_21] : memref<48x512xf32, #tpu.memory_space<vmem>>, vector<8x512xf32>
    %c128_22 = arith.constant 128 : index
    %c0_23 = arith.constant 0 : index
    %46 = vector.load %arg3[%c128_22, %c0_23] : memref<256x512xf32, #tpu.memory_space<vmem>>, vector<128x512xf32>
    %cst_24 = arith.constant dense<0.000000e+00> : vector<8x512xf32>
    %47 = tpu.matmul %43, %46, %cst_24 {dimension_numbers = #tpu.dot_dimension_numbers<[1], [0], [0], [1], [0, 0, 1, 1], [], []>} : vector<8x128xf32>, vector<128x512xf32>, vector<8x512xf32> -> vector<8x512xf32>
    %48 = arith.addf %45, %47 : vector<8x512xf32>
    %49 = vector.extract_strided_slice %48 {offsets = [0, 0], sizes = [8, 128], strides = [1, 1]} : vector<8x512xf32> to vector<8x128xf32>
    %50 = arith.negf %49 : vector<8x128xf32>
    %51 = math.exp %50 : vector<8x128xf32>
    %cst_25 = arith.constant 1.000000e+00 : f32
    %52 = vector.broadcast %cst_25 : f32 to vector<8x128xf32>
    %53 = arith.addf %52, %51 : vector<8x128xf32>
    %54 = arith.divf %52, %53 : vector<8x128xf32>
    %55 = vector.extract_strided_slice %48 {offsets = [0, 128], sizes = [8, 128], strides = [1, 1]} : vector<8x512xf32> to vector<8x128xf32>
    %56 = arith.negf %55 : vector<8x128xf32>
    %57 = math.exp %56 : vector<8x128xf32>
    %cst_26 = arith.constant 1.000000e+00 : f32
    %58 = vector.broadcast %cst_26 : f32 to vector<8x128xf32>
    %59 = arith.addf %58, %57 : vector<8x128xf32>
    %60 = arith.divf %58, %59 : vector<8x128xf32>
    %61 = vector.extract_strided_slice %48 {offsets = [0, 256], sizes = [8, 128], strides = [1, 1]} : vector<8x512xf32> to vector<8x128xf32>
    %62 = math.tanh %61 : vector<8x128xf32>
    %63 = vector.extract_strided_slice %48 {offsets = [0, 384], sizes = [8, 128], strides = [1, 1]} : vector<8x512xf32> to vector<8x128xf32>
    %64 = arith.negf %63 : vector<8x128xf32>
    %65 = math.exp %64 : vector<8x128xf32>
    %cst_27 = arith.constant 1.000000e+00 : f32
    %66 = vector.broadcast %cst_27 : f32 to vector<8x128xf32>
    %67 = arith.addf %66, %65 : vector<8x128xf32>
    %68 = arith.divf %66, %67 : vector<8x128xf32>
    %69 = arith.mulf %60, %41 : vector<8x128xf32>
    %70 = arith.mulf %54, %62 : vector<8x128xf32>
    %71 = arith.addf %69, %70 : vector<8x128xf32>
    %72 = math.tanh %71 : vector<8x128xf32>
    %73 = arith.mulf %68, %72 : vector<8x128xf32>
    %c8_28 = arith.constant 8 : index
    %c0_29 = arith.constant 0 : index
    %74 = vector.load %arg7[%c8_28, %c0_29] : memref<48x128xf32, #tpu.memory_space<vmem>>, vector<8x128xf32>
    tpu.vector_store %arg7[%c8_28, %c0_29], %73 {strides = array<i32>} : memref<48x128xf32, #tpu.memory_space<vmem>>, vector<8x128xf32>,
    %c16 = arith.constant 16 : index
    %c0_30 = arith.constant 0 : index
    %75 = vector.load %arg6[%c16, %c0_30] : memref<48x512xf32, #tpu.memory_space<vmem>>, vector<8x512xf32>
    %c128_31 = arith.constant 128 : index
    %c0_32 = arith.constant 0 : index
    %76 = vector.load %arg3[%c128_31, %c0_32] : memref<256x512xf32, #tpu.memory_space<vmem>>, vector<128x512xf32>
    %cst_33 = arith.constant dense<0.000000e+00> : vector<8x512xf32>
    %77 = tpu.matmul %73, %76, %cst_33 {dimension_numbers = #tpu.dot_dimension_numbers<[1], [0], [0], [1], [0, 0, 1, 1], [], []>} : vector<8x128xf32>, vector<128x512xf32>, vector<8x512xf32> -> vector<8x512xf32>
    %78 = arith.addf %75, %77 : vector<8x512xf32>
    %79 = vector.extract_strided_slice %78 {offsets = [0, 0], sizes = [8, 128], strides = [1, 1]} : vector<8x512xf32> to vector<8x128xf32>
    %80 = arith.negf %79 : vector<8x128xf32>
    %81 = math.exp %80 : vector<8x128xf32>
    %cst_34 = arith.constant 1.000000e+00 : f32
    %82 = vector.broadcast %cst_34 : f32 to vector<8x128xf32>
    %83 = arith.addf %82, %81 : vector<8x128xf32>
    %84 = arith.divf %82, %83 : vector<8x128xf32>
    %85 = vector.extract_strided_slice %78 {offsets = [0, 128], sizes = [8, 128], strides = [1, 1]} : vector<8x512xf32> to vector<8x128xf32>
    %86 = arith.negf %85 : vector<8x128xf32>
    %87 = math.exp %86 : vector<8x128xf32>
    %cst_35 = arith.constant 1.000000e+00 : f32
    %88 = vector.broadcast %cst_35 : f32 to vector<8x128xf32>
    %89 = arith.addf %88, %87 : vector<8x128xf32>
    %90 = arith.divf %88, %89 : vector<8x128xf32>
    %91 = vector.extract_strided_slice %78 {offsets = [0, 256], sizes = [8, 128], strides = [1, 1]} : vector<8x512xf32> to vector<8x128xf32>
    %92 = math.tanh %91 : vector<8x128xf32>
    %93 = vector.extract_strided_slice %78 {offsets = [0, 384], sizes = [8, 128], strides = [1, 1]} : vector<8x512xf32> to vector<8x128xf32>
    %94 = arith.negf %93 : vector<8x128xf32>
    %95 = math.exp %94 : vector<8x128xf32>
    %cst_36 = arith.constant 1.000000e+00 : f32
    %96 = vector.broadcast %cst_36 : f32 to vector<8x128xf32>
    %97 = arith.addf %96, %95 : vector<8x128xf32>
    %98 = arith.divf %96, %97 : vector<8x128xf32>
    %99 = arith.mulf %90, %71 : vector<8x128xf32>
    %100 = arith.mulf %84, %92 : vector<8x128xf32>
    %101 = arith.addf %99, %100 : vector<8x128xf32>
    %102 = math.tanh %101 : vector<8x128xf32>
    %103 = arith.mulf %98, %102 : vector<8x128xf32>
    %c16_37 = arith.constant 16 : index
    %c0_38 = arith.constant 0 : index
    %104 = vector.load %arg7[%c16_37, %c0_38] : memref<48x128xf32, #tpu.memory_space<vmem>>, vector<8x128xf32>
    tpu.vector_store %arg7[%c16_37, %c0_38], %103 {strides = array<i32>} : memref<48x128xf32, #tpu.memory_space<vmem>>, vector<8x128xf32>,
    %c24 = arith.constant 24 : index
    %c0_39 = arith.constant 0 : index
    %105 = vector.load %arg6[%c24, %c0_39] : memref<48x512xf32, #tpu.memory_space<vmem>>, vector<8x512xf32>
    %c128_40 = arith.constant 128 : index
    %c0_41 = arith.constant 0 : index
    %106 = vector.load %arg3[%c128_40, %c0_41] : memref<256x512xf32, #tpu.memory_space<vmem>>, vector<128x512xf32>
    %cst_42 = arith.constant dense<0.000000e+00> : vector<8x512xf32>
    %107 = tpu.matmul %103, %106, %cst_42 {dimension_numbers = #tpu.dot_dimension_numbers<[1], [0], [0], [1], [0, 0, 1, 1], [], []>} : vector<8x128xf32>, vector<128x512xf32>, vector<8x512xf32> -> vector<8x512xf32>
    %108 = arith.addf %105, %107 : vector<8x512xf32>
    %109 = vector.extract_strided_slice %108 {offsets = [0, 0], sizes = [8, 128], strides = [1, 1]} : vector<8x512xf32> to vector<8x128xf32>
    %110 = arith.negf %109 : vector<8x128xf32>
    %111 = math.exp %110 : vector<8x128xf32>
    %cst_43 = arith.constant 1.000000e+00 : f32
    %112 = vector.broadcast %cst_43 : f32 to vector<8x128xf32>
    %113 = arith.addf %112, %111 : vector<8x128xf32>
    %114 = arith.divf %112, %113 : vector<8x128xf32>
    %115 = vector.extract_strided_slice %108 {offsets = [0, 128], sizes = [8, 128], strides = [1, 1]} : vector<8x512xf32> to vector<8x128xf32>
    %116 = arith.negf %115 : vector<8x128xf32>
    %117 = math.exp %116 : vector<8x128xf32>
    %cst_44 = arith.constant 1.000000e+00 : f32
    %118 = vector.broadcast %cst_44 : f32 to vector<8x128xf32>
    %119 = arith.addf %118, %117 : vector<8x128xf32>
    %120 = arith.divf %118, %119 : vector<8x128xf32>
    %121 = vector.extract_strided_slice %108 {offsets = [0, 256], sizes = [8, 128], strides = [1, 1]} : vector<8x512xf32> to vector<8x128xf32>
    %122 = math.tanh %121 : vector<8x128xf32>
    %123 = vector.extract_strided_slice %108 {offsets = [0, 384], sizes = [8, 128], strides = [1, 1]} : vector<8x512xf32> to vector<8x128xf32>
    %124 = arith.negf %123 : vector<8x128xf32>
    %125 = math.exp %124 : vector<8x128xf32>
    %cst_45 = arith.constant 1.000000e+00 : f32
    %126 = vector.broadcast %cst_45 : f32 to vector<8x128xf32>
    %127 = arith.addf %126, %125 : vector<8x128xf32>
    %128 = arith.divf %126, %127 : vector<8x128xf32>
    %129 = arith.mulf %120, %101 : vector<8x128xf32>
    %130 = arith.mulf %114, %122 : vector<8x128xf32>
    %131 = arith.addf %129, %130 : vector<8x128xf32>
    %132 = math.tanh %131 : vector<8x128xf32>
    %133 = arith.mulf %128, %132 : vector<8x128xf32>
    %c24_46 = arith.constant 24 : index
    %c0_47 = arith.constant 0 : index
    %134 = vector.load %arg7[%c24_46, %c0_47] : memref<48x128xf32, #tpu.memory_space<vmem>>, vector<8x128xf32>
    tpu.vector_store %arg7[%c24_46, %c0_47], %133 {strides = array<i32>} : memref<48x128xf32, #tpu.memory_space<vmem>>, vector<8x128xf32>,
    %c32 = arith.constant 32 : index
    %c0_48 = arith.constant 0 : index
    %135 = vector.load %arg6[%c32, %c0_48] : memref<48x512xf32, #tpu.memory_space<vmem>>, vector<8x512xf32>
    %c128_49 = arith.constant 128 : index
    %c0_50 = arith.constant 0 : index
    %136 = vector.load %arg3[%c128_49, %c0_50] : memref<256x512xf32, #tpu.memory_space<vmem>>, vector<128x512xf32>
    %cst_51 = arith.constant dense<0.000000e+00> : vector<8x512xf32>
    %137 = tpu.matmul %133, %136, %cst_51 {dimension_numbers = #tpu.dot_dimension_numbers<[1], [0], [0], [1], [0, 0, 1, 1], [], []>} : vector<8x128xf32>, vector<128x512xf32>, vector<8x512xf32> -> vector<8x512xf32>
    %138 = arith.addf %135, %137 : vector<8x512xf32>
    %139 = vector.extract_strided_slice %138 {offsets = [0, 0], sizes = [8, 128], strides = [1, 1]} : vector<8x512xf32> to vector<8x128xf32>
    %140 = arith.negf %139 : vector<8x128xf32>
    %141 = math.exp %140 : vector<8x128xf32>
    %cst_52 = arith.constant 1.000000e+00 : f32
    %142 = vector.broadcast %cst_52 : f32 to vector<8x128xf32>
    %143 = arith.addf %142, %141 : vector<8x128xf32>
    %144 = arith.divf %142, %143 : vector<8x128xf32>
    %145 = vector.extract_strided_slice %138 {offsets = [0, 128], sizes = [8, 128], strides = [1, 1]} : vector<8x512xf32> to vector<8x128xf32>
    %146 = arith.negf %145 : vector<8x128xf32>
    %147 = math.exp %146 : vector<8x128xf32>
    %cst_53 = arith.constant 1.000000e+00 : f32
    %148 = vector.broadcast %cst_53 : f32 to vector<8x128xf32>
    %149 = arith.addf %148, %147 : vector<8x128xf32>
    %150 = arith.divf %148, %149 : vector<8x128xf32>
    %151 = vector.extract_strided_slice %138 {offsets = [0, 256], sizes = [8, 128], strides = [1, 1]} : vector<8x512xf32> to vector<8x128xf32>
    %152 = math.tanh %151 : vector<8x128xf32>
    %153 = vector.extract_strided_slice %138 {offsets = [0, 384], sizes = [8, 128], strides = [1, 1]} : vector<8x512xf32> to vector<8x128xf32>
    %154 = arith.negf %153 : vector<8x128xf32>
    %155 = math.exp %154 : vector<8x128xf32>
    %cst_54 = arith.constant 1.000000e+00 : f32
    %156 = vector.broadcast %cst_54 : f32 to vector<8x128xf32>
    %157 = arith.addf %156, %155 : vector<8x128xf32>
    %158 = arith.divf %156, %157 : vector<8x128xf32>
    %159 = arith.mulf %150, %131 : vector<8x128xf32>
    %160 = arith.mulf %144, %152 : vector<8x128xf32>
    %161 = arith.addf %159, %160 : vector<8x128xf32>
    %162 = math.tanh %161 : vector<8x128xf32>
    %163 = arith.mulf %158, %162 : vector<8x128xf32>
    %c32_55 = arith.constant 32 : index
    %c0_56 = arith.constant 0 : index
    %164 = vector.load %arg7[%c32_55, %c0_56] : memref<48x128xf32, #tpu.memory_space<vmem>>, vector<8x128xf32>
    tpu.vector_store %arg7[%c32_55, %c0_56], %163 {strides = array<i32>} : memref<48x128xf32, #tpu.memory_space<vmem>>, vector<8x128xf32>,
    %c40 = arith.constant 40 : index
    %c0_57 = arith.constant 0 : index
    %165 = vector.load %arg6[%c40, %c0_57] : memref<48x512xf32, #tpu.memory_space<vmem>>, vector<8x512xf32>
    %c128_58 = arith.constant 128 : index
    %c0_59 = arith.constant 0 : index
    %166 = vector.load %arg3[%c128_58, %c0_59] : memref<256x512xf32, #tpu.memory_space<vmem>>, vector<128x512xf32>
    %cst_60 = arith.constant dense<0.000000e+00> : vector<8x512xf32>
    %167 = tpu.matmul %163, %166, %cst_60 {dimension_numbers = #tpu.dot_dimension_numbers<[1], [0], [0], [1], [0, 0, 1, 1], [], []>} : vector<8x128xf32>, vector<128x512xf32>, vector<8x512xf32> -> vector<8x512xf32>
    %168 = arith.addf %165, %167 : vector<8x512xf32>
    %169 = vector.extract_strided_slice %168 {offsets = [0, 0], sizes = [8, 128], strides = [1, 1]} : vector<8x512xf32> to vector<8x128xf32>
    %170 = arith.negf %169 : vector<8x128xf32>
    %171 = math.exp %170 : vector<8x128xf32>
    %cst_61 = arith.constant 1.000000e+00 : f32
    %172 = vector.broadcast %cst_61 : f32 to vector<8x128xf32>
    %173 = arith.addf %172, %171 : vector<8x128xf32>
    %174 = arith.divf %172, %173 : vector<8x128xf32>
    %175 = vector.extract_strided_slice %168 {offsets = [0, 128], sizes = [8, 128], strides = [1, 1]} : vector<8x512xf32> to vector<8x128xf32>
    %176 = arith.negf %175 : vector<8x128xf32>
    %177 = math.exp %176 : vector<8x128xf32>
    %cst_62 = arith.constant 1.000000e+00 : f32
    %178 = vector.broadcast %cst_62 : f32 to vector<8x128xf32>
    %179 = arith.addf %178, %177 : vector<8x128xf32>
    %180 = arith.divf %178, %179 : vector<8x128xf32>
    %181 = vector.extract_strided_slice %168 {offsets = [0, 256], sizes = [8, 128], strides = [1, 1]} : vector<8x512xf32> to vector<8x128xf32>
    %182 = math.tanh %181 : vector<8x128xf32>
    %183 = vector.extract_strided_slice %168 {offsets = [0, 384], sizes = [8, 128], strides = [1, 1]} : vector<8x512xf32> to vector<8x128xf32>
    %184 = arith.negf %183 : vector<8x128xf32>
    %185 = math.exp %184 : vector<8x128xf32>
    %cst_63 = arith.constant 1.000000e+00 : f32
    %186 = vector.broadcast %cst_63 : f32 to vector<8x128xf32>
    %187 = arith.addf %186, %185 : vector<8x128xf32>
    %188 = arith.divf %186, %187 : vector<8x128xf32>
    %189 = arith.mulf %180, %161 : vector<8x128xf32>
    %190 = arith.mulf %174, %182 : vector<8x128xf32>
    %191 = arith.addf %189, %190 : vector<8x128xf32>
    %192 = math.tanh %191 : vector<8x128xf32>
    %193 = arith.mulf %188, %192 : vector<8x128xf32>
    %c40_64 = arith.constant 40 : index
    %c0_65 = arith.constant 0 : index
    %194 = vector.load %arg7[%c40_64, %c0_65] : memref<48x128xf32, #tpu.memory_space<vmem>>, vector<8x128xf32>
    tpu.vector_store %arg7[%c40_64, %c0_65], %193 {strides = array<i32>} : memref<48x128xf32, #tpu.memory_space<vmem>>, vector<8x128xf32>,
    %c0_66 = arith.constant 0 : index
    %c0_67 = arith.constant 0 : index
    %195 = vector.load %arg7[%c0_66, %c0_67] : memref<48x128xf32, #tpu.memory_space<vmem>>, vector<48x128xf32>
    %c0_68 = arith.constant 0 : index
    %c0_69 = arith.constant 0 : index
    %196 = vector.load %arg4[%c0_68, %c0_69] : memref<264x128xf32, #tpu.memory_space<vmem>>, vector<128x128xf32>
    %cst_70 = arith.constant dense<0.000000e+00> : vector<48x128xf32>
    %197 = tpu.matmul %195, %196, %cst_70 {dimension_numbers = #tpu.dot_dimension_numbers<[1], [0], [0], [1], [0, 0, 1, 1], [], []>} : vector<48x128xf32>, vector<128x128xf32>, vector<48x128xf32> -> vector<48x128xf32>
    %c128_71 = arith.constant 128 : index
    %c0_72 = arith.constant 0 : index
    %198 = vector.load %arg4[%c128_71, %c0_72] : memref<264x128xf32, #tpu.memory_space<vmem>>, vector<1x128xf32>
    %199 = vector.broadcast %198 : vector<1x128xf32> to vector<48x128xf32>
    %200 = arith.addf %197, %199 : vector<48x128xf32>
    %cst_73 = arith.constant 0.000000e+00 : f32
    %201 = vector.broadcast %cst_73 : f32 to vector<48x128xf32>
    %202 = arith.maximumf %200, %201 : vector<48x128xf32>
    %c136 = arith.constant 136 : index
    %c0_74 = arith.constant 0 : index
    %203 = vector.load %arg4[%c136, %c0_74] : memref<264x128xf32, #tpu.memory_space<vmem>>, vector<128x128xf32>
    %cst_75 = arith.constant dense<0.000000e+00> : vector<48x128xf32>
    %204 = tpu.matmul %202, %203, %cst_75 {dimension_numbers = #tpu.dot_dimension_numbers<[1], [0], [0], [1], [0, 0, 1, 1], [], []>} : vector<48x128xf32>, vector<128x128xf32>, vector<48x128xf32> -> vector<48x128xf32>
    %c129 = arith.constant 129 : index
    %c0_76 = arith.constant 0 : index
    %205 = vector.load %arg4[%c129, %c0_76] : memref<264x128xf32, #tpu.memory_space<vmem>>, vector<1x128xf32>
    %206 = vector.broadcast %205 : vector<1x128xf32> to vector<48x128xf32>
    %207 = arith.addf %204, %206 : vector<48x128xf32>
    %cst_77 = arith.constant 0.000000e+00 : f32
    %208 = vector.broadcast %cst_77 : f32 to vector<48x128xf32>
    %209 = arith.maximumf %207, %208 : vector<48x128xf32>
    %210 = tpu.iota {dimensions = array<i32: 1>} : vector<48x128xi32>
    %c6_i32_78 = arith.constant 6 : i32
    %211 = vector.broadcast %c6_i32_78 : i32 to vector<48x128xi32>
    %212 = arith.cmpi slt, %210, %211 : vector<48x128xi32>
    %cst_79 = arith.constant -1.000000e+30 : f32
    %213 = vector.broadcast %cst_79 : f32 to vector<48x128xf32>
    %214 = arith.select %212, %209, %213 : vector<48x128xi1>, vector<48x128xf32>
    %cst_80 = arith.constant dense<0xFF800000> : vector<48xf32>
    %215 = vector.multi_reduction <maximumf>, %214, %cst_80 [1] : vector<48x128xf32> to vector<48xf32>
    %216 = vector.shape_cast %215 : vector<48xf32> to vector<48x1xf32>
    %c6_i32_81 = arith.constant 6 : i32
    %217 = vector.broadcast %c6_i32_81 : i32 to vector<48x128xi32>
    %218 = arith.cmpi slt, %210, %217 : vector<48x128xi32>
    %219 = vector.broadcast %216 : vector<48x1xf32> to vector<48x128xf32>
    %220 = arith.subf %209, %219 : vector<48x128xf32>
    %221 = math.exp %220 : vector<48x128xf32>
    %cst_82 = arith.constant 0.000000e+00 : f32
    %222 = vector.broadcast %cst_82 : f32 to vector<48x128xf32>
    %223 = arith.select %218, %221, %222 : vector<48x128xi1>, vector<48x128xf32>
    %224 = vector.broadcast %216 : vector<48x1xf32> to vector<48x128xf32>
    %225 = arith.subf %209, %224 : vector<48x128xf32>
    %cst_83 = arith.constant dense<0.000000e+00> : vector<48xf32>
    %226 = vector.multi_reduction <add>, %223, %cst_83 [1] : vector<48x128xf32> to vector<48xf32>
    %227 = vector.shape_cast %226 : vector<48xf32> to vector<48x1xf32>
    %228 = math.log %227 : vector<48x1xf32>
    %229 = vector.broadcast %228 : vector<48x1xf32> to vector<48x128xf32>
    %230 = arith.subf %225, %229 : vector<48x128xf32>
    %c0_84 = arith.constant 0 : index
    %c0_85 = arith.constant 0 : index
    %231 = vector.load %arg5[%c0_84, %c0_85] : memref<64x128xf32, #tpu.memory_space<vmem>>, vector<48x128xf32>
    tpu.vector_store %arg5[%c0_84, %c0_85], %230 {strides = array<i32>} : memref<64x128xf32, #tpu.memory_space<vmem>>, vector<48x128xf32>,
    %c48 = arith.constant 48 : index
    %c0_86 = arith.constant 0 : index
    %232 = vector.load %arg5[%c48, %c0_86] : memref<64x128xf32, #tpu.memory_space<vmem>>, vector<8x128xf32>
    tpu.vector_store %arg5[%c48, %c0_86], %193 {strides = array<i32>} : memref<64x128xf32, #tpu.memory_space<vmem>>, vector<8x128xf32>,
    %c56 = arith.constant 56 : index
    %c0_87 = arith.constant 0 : index
    %233 = vector.load %arg5[%c56, %c0_87] : memref<64x128xf32, #tpu.memory_space<vmem>>, vector<8x128xf32>
    tpu.vector_store %arg5[%c56, %c0_87], %191 {strides = array<i32>} : memref<64x128xf32, #tpu.memory_space<vmem>>, vector<8x128xf32>,
    return
  }
  func.func @transform_0(%arg0: i32) -> (i32, i32) {
    %c0_i32 = arith.constant 0 : i32
    %c0_i32_0 = arith.constant 0 : i32
    return %arg0, %c0_i32 : i32, i32
  }
  func.func @transform_1(%arg0: i32) -> (i32, i32) {
    %c0_i32 = arith.constant 0 : i32
    %c0_i32_0 = arith.constant 0 : i32
    return %arg0, %c0_i32 : i32, i32
  }
  func.func @transform_2(%arg0: i32) -> (i32, i32) {
    %c0_i32 = arith.constant 0 : i32
    %c0_i32_0 = arith.constant 0 : i32
    %c0_i32_1 = arith.constant 0 : i32
    return %c0_i32, %c0_i32_0 : i32, i32
  }
  func.func @transform_3(%arg0: i32) -> (i32, i32) {
    %c0_i32 = arith.constant 0 : i32
    %c0_i32_0 = arith.constant 0 : i32
    %c0_i32_1 = arith.constant 0 : i32
    return %c0_i32, %c0_i32_0 : i32, i32
  }
  func.func @transform_4(%arg0: i32) -> (i32, i32) {
    %c0_i32 = arith.constant 0 : i32
    %c0_i32_0 = arith.constant 0 : i32
    return %arg0, %c0_i32 : i32, i32
  }
}

</mosaic_0001>

<bundles_post_ra>
// kernel: revised_decoder_forward_batched.1
= control target key start
LH: loop header
LB: loop body
LE: loop exit
PB: predicated region body
PF: predicated region fallthrough
CT: control target
= control target key end

     0   :  { %9 = vsyncpa [#allocation5], 0  ;;  %s2755_s15 = smov 0   ;;  %s3754_s0 = inlined_call_operand.vmem [shape: f32[96,128], index: 0, kind: input, shape index: {}]   ;;  %s3755_s1 = inlined_call_operand.vmem [shape: f32[16,256], index: 1, kind: input, shape index: {}]   ;;  %s3756_s2 = inlined_call_operand.hbm [shape: f32[256,512], index: 2, kind: input, shape index: {}]   ;;  %s3757_s3 = inlined_call_operand.vmem [shape: f32[264,128], index: 3, kind: input, shape index: {}]   ;;  %s3758_s4 = inlined_call_operand.vmem [shape: f32[128,128], index: 4, kind: output, shape index: {}]  }
   0x1 LB: > { %s2761_s16 = sadd.s32 4294967295, %s2724_s15   ;;  %p2385_p0 = scmp.ge.s32.totalorder %s2724_s15, 1  ;;  %s2724_s15 = sphi %s2755_s15, %s15_s15  }
   0x2   : > { %p140_p1 = scmp.lt.s32.totalorder %s2724_s15, 3  ;;  %s2726_s17 = smov [#allocation4]  }
   0x3   : > { %s152_s18 = sshll.u32 %s2726_s17, 4  ;;  %p2554_p3 = scmp.eq.s32.totalorder %s2761_s16, 0  ;;  %s153_s18 = int_to_ptr.vmem [resolvable:$true] %s152_s18 }
   0x4   : > { %p2765_p2 = pnand %p2385_p0, %p140_p1  ;;  %s2699_s20 = scalar_lea.vmem %s153_s18, 16384 }
   0x5   : > { %p2700_p7 = scmp.ne.s32.totalorder %s153_s18, %s2699_s20  ;;  %p2707_p10 = scmp.lt.s32.totalorder %s153_s18, %s153_s18 }
   0x6   : > { %p2550_p4 = pneg %p2765_p2  ;;  %p2708_p11 = scmp.lt.s32.totalorder %s2699_s20, %s2699_s20 }
   0x8   : > { %p2551_p5 = pnand %p2554_p3, %p2550_p4  ;;  %p2709_p12 = por %p2708_p11, %p2707_p10 }
   0xa   : > { %p2690_p6 = pneg %p2551_p5 }
   0xc   : > { %p2702_p8 = pnand %p2700_p7, %p2690_p6 }
   0xe   : > { %p2703_p9 = pneg %p2702_p8 }
  0x10   : > { %p2710_p13 = pnand %p2709_p12, %p2703_p9 }
  0x12   : > { %2713 = shalt.err (!%p2710_p13)
}
  0x13   : > { %s2727_s21 = smov 512   ;;  %s2728_s22 = smov 32  }
  0x14   : > { %2553 = dma.hbm_to_vmem [thread:$0]  (!%p2551_p5), %s3756_s2, 16384, %s153_s18, [#allocation5], %s2727_s21, %s2727_s21, %s2728_s22  }
  0x15   : > { %188 = sbr.rel (%p2765_p2) target bundleno = 2313 (0x909), region = 36 }
  0x1a   : > { %2719 = dma.done.wait (%p2554_p3), [#allocation5], 16384  }
  0x1b   : > { %2721 = vsyncadd (%p2554_p3), [#allocation5], 4294950912  ;;  %v3763_v0 = vmov 0.0   ;;  %v303_v1 = vld [vmem:[#allocation4 + $0x1e8] sm:$0xff]  ;;  %v305_v2 = vld [vmem:[#allocation4 + $0x1f8] sm:$0xff]  ;;  %s219_s25 = smul.u32 6, %s2761_s16 }
  0x1c   : > { %370 = vmatprep.mubr.f32.mxu0 %v3763_v0  ;;  %471 = vmatprep.mubr.f32.mxu1 %v3763_v0  ;;  %v302_v3 = vld [vmem:[#allocation4 + $0x1e0] sm:$0xff]  ;;  %v304_v4 = vld [vmem:[#allocation4 + $0x1f0] sm:$0xff]  ;;  %v299_v5 = vld [vmem:[#allocation4 + $0x1c8] sm:$0xff]  ;;  %p225_p1 = scmp.lt.s32.totalorder %s2761_s16, 1  ;;  %s2393_s28 = sshll.u32 %s2761_s16, 3 }
  0x1d   : > { %306 = vmatprep.subr.mxu0 %v303_v1  ;;  %407 = vmatprep.subr.mxu1 %v305_v2  ;;  %v301_v6 = vld [vmem:[#allocation4 + $0x1d8] sm:$0xff]  ;;  %v298_v7 = vld [vmem:[#allocation4 + $0x1c0] sm:$0xff]  ;;  %v300_v8 = vld [vmem:[#allocation4 + $0x1d0] sm:$0xff]  ;;  %p2788_p0 = scmp.lt.s32.totalorder %s219_s25, 11  ;;  %p231_p2 = scmp.lt.s32.totalorder %s2393_s28, 15 }
  0x1e   : > { %307 = vmatpush1.msra.mxu0 %v302_v3  ;;  %408 = vmatpush1.msra.mxu1 %v304_v4  ;;  %v295_v9 = vld [vmem:[#allocation4 + $0x1a8] sm:$0xff]  ;;  %v297_v10 = vld [vmem:[#allocation4 + $0x1b8] sm:$0xff]  ;;  %v294_v11 = vld [vmem:[#allocation4 + $0x1a0] sm:$0xff]  ;;  %s2970_s5 = scalar_select %p225_p1, %s2761_s16, 1 }
  0x1f   : > { %308 = vmatprep.subr.mxu0 %v299_v5  ;;  %409 = vmatprep.subr.mxu1 %v301_v6  ;;  %v296_v12 = vld [vmem:[#allocation4 + $0x1b0] sm:$0xff]  ;;  %v291_v13 = vld [vmem:[#allocation4 + $0x188] sm:$0xff]  ;;  %v293_v14 = vld [vmem:[#allocation4 + $0x198] sm:$0xff]  ;;  %s3956_s25 = smov (!%p2788_p0, %s219_s25), 11  ;;  %s3958_s28 = smov (!%p231_p2, %s2393_s28), 15 }
  0x20   : > { %309 = vmatpush1.msra.mxu0 %v298_v7  ;;  %410 = vmatpush1.msra.mxu1 %v300_v8  ;;  %v290_v15 = vld [vmem:[#allocation4 + $0x180] sm:$0xff]  ;;  %v292_v16 = vld [vmem:[#allocation4 + $0x190] sm:$0xff]  ;;  %v287_v17 = vld [vmem:[#allocation4 + $0x168] sm:$0xff]  ;;  %s2390_s27 = sshll.u32 %s3956_s25, 3  ;;  %s2419_s6 = sshll.u32 %s2970_s5, 4 }
  0x21   : > { %310 = vmatprep.subr.mxu0 %v295_v9  ;;  %411 = vmatprep.subr.mxu1 %v297_v10  ;;  %v289_v18 = vld [vmem:[#allocation4 + $0x178] sm:$0xff]  ;;  %v286_v19 = vld [vmem:[#allocation4 + $0x160] sm:$0xff]  ;;  %v288_v20 = vld [vmem:[#allocation4 + $0x170] sm:$0xff]  ;;  %s2802_s30 = scalar_lea.vmem %s3754_s0, %s2390_s27  ;;  %s3013_s9 = scalar_lea.vmem %s3755_s1, %s2419_s6 }
  0x22   : > { %311 = vmatpush1.msra.mxu0 %v294_v11  ;;  %412 = vmatpush1.msra.mxu1 %v296_v12  ;;  %v283_v21 = vld [vmem:[#allocation4 + $0x148] sm:$0xff]  ;;  %v285_v22 = vld [vmem:[#allocation4 + $0x158] sm:$0xff]  ;;  %v282_v23 = vld [vmem:[#allocation4 + $0x140] sm:$0xff]  ;;  %s2394_s5 = sshll.u32 %s3958_s28, 3 }
  0x23   : > { %312 = vmatprep.subr.mxu0 %v291_v13  ;;  %413 = vmatprep.subr.mxu1 %v293_v14  ;;  %v284_v24 = vld [vmem:[#allocation4 + $0x150] sm:$0xff]  ;;  %v279_v25 = vld [vmem:[#allocation4 + $0x128] sm:$0xff]  ;;  %v281_v26 = vld [vmem:[#allocation4 + $0x138] sm:$0xff]  ;;  %s3698_s7 = scalar_lea.vmem %s3758_s4, %s2394_s5 }
  0x24   : > { %313 = vmatpush1.msra.mxu0 %v290_v15  ;;  %414 = vmatpush1.msra.mxu1 %v292_v16  ;;  %v278_v27 = vld [vmem:[#allocation4 + $0x120] sm:$0xff]  ;;  %v280_v28 = vld [vmem:[#allocation4 + $0x130] sm:$0xff]  ;;  %v275_v29 = vld [vmem:[#allocation4 + $0x108] sm:$0xff] }
  0x25   : > { %314 = vmatprep.subr.mxu0 %v287_v17  ;;  %415 = vmatprep.subr.mxu1 %v289_v18  ;;  %v277_v30 = vld [vmem:[#allocation4 + $0x118] sm:$0xff]  ;;  %v274_v31 = vld [vmem:[#allocation4 + $0x100] sm:$0xff]  ;;  %v276_v32 = vld [vmem:[#allocation4 + $0x110] sm:$0xff] }
  0x26   : > { %315 = vmatpush1.msra.mxu0 %v286_v19  ;;  %416 = vmatpush1.msra.mxu1 %v288_v20  ;;  %v271_v33 = vld [vmem:[#allocation4 + $0xe8] sm:$0xff]  ;;  %v273_v34 = vld [vmem:[#allocation4 + $0xf8] sm:$0xff]  ;;  %v270_v35 = vld [vmem:[#allocation4 + $0xe0] sm:$0xff] }
  0x27   : > { %316 = vmatprep.subr.mxu0 %v283_v21  ;;  %417 = vmatprep.subr.mxu1 %v285_v22  ;;  %v272_v36 = vld [vmem:[#allocation4 + $0xf0] sm:$0xff]  ;;  %v267_v37 = vld [vmem:[#allocation4 + $0xc8] sm:$0xff]  ;;  %v269_v38 = vld [vmem:[#allocation4 + $0xd8] sm:$0xff] }
  0x28   : > { %317 = vmatpush1.msra.mxu0 %v282_v23  ;;  %418 = vmatpush1.msra.mxu1 %v284_v24  ;;  %v266_v39 = vld [vmem:[#allocation4 + $0xc0] sm:$0xff]  ;;  %v268_v40 = vld [vmem:[#allocation4 + $0xd0] sm:$0xff]  ;;  %v263_v41 = vld [vmem:[#allocation4 + $0xa8] sm:$0xff] }
  0x29   : > { %318 = vmatprep.subr.mxu0 %v279_v25  ;;  %419 = vmatprep.subr.mxu1 %v281_v26  ;;  %v265_v42 = vld [vmem:[#allocation4 + $0xb8] sm:$0xff]  ;;  %v262_v43 = vld [vmem:[#allocation4 + $0xa0] sm:$0xff]  ;;  %v264_v44 = vld [vmem:[#allocation4 + $0xb0] sm:$0xff] }
  0x2a   : > { %319 = vmatpush1.msra.mxu0 %v278_v27  ;;  %420 = vmatpush1.msra.mxu1 %v280_v28  ;;  %v259_v45 = vld [vmem:[#allocation4 + $0x88] sm:$0xff]  ;;  %v261_v46 = vld [vmem:[#allocation4 + $0x98] sm:$0xff]  ;;  %v258_v47 = vld [vmem:[#allocation4 + $0x80] sm:$0xff] }
  0x2b   : > { %320 = vmatprep.subr.mxu0 %v275_v29  ;;  %421 = vmatprep.subr.mxu1 %v277_v30  ;;  %v260_v48 = vld [vmem:[#allocation4 + $0x90] sm:$0xff]  ;;  %v255_v49 = vld [vmem:[#allocation4 + $0x68] sm:$0xff]  ;;  %v257_v50 = vld [vmem:[#allocation4 + $0x78] sm:$0xff] }
  0x2c   : > { %321 = vmatpush1.msra.mxu0 %v274_v31  ;;  %422 = vmatpush1.msra.mxu1 %v276_v32  ;;  %v254_v51 = vld [vmem:[#allocation4 + $0x60] sm:$0xff]  ;;  %v256_v52 = vld [vmem:[#allocation4 + $0x70] sm:$0xff]  ;;  %v251_v53 = vld [vmem:[#allocation4 + $0x48] sm:$0xff] }
  0x2d   : > { %322 = vmatprep.subr.mxu0 %v271_v33  ;;  %423 = vmatprep.subr.mxu1 %v273_v34  ;;  %v253_v54 = vld [vmem:[#allocation4 + $0x58] sm:$0xff]  ;;  %v250_v55 = vld [vmem:[#allocation4 + $0x40] sm:$0xff]  ;;  %v252_v56 = vld [vmem:[#allocation4 + $0x50] sm:$0xff] }
  0x2e   : > { %323 = vmatpush1.msra.mxu0 %v270_v35  ;;  %424 = vmatpush1.msra.mxu1 %v272_v36  ;;  %v247_v57 = vld [vmem:[#allocation4 + $0x28] sm:$0xff]  ;;  %v249_v58 = vld [vmem:[#allocation4 + $0x38] sm:$0xff]  ;;  %v246_v59 = vld [vmem:[#allocation4 + $0x20] sm:$0xff] }
  0x2f   : > { %324 = vmatprep.subr.mxu0 %v267_v37  ;;  %425 = vmatprep.subr.mxu1 %v269_v38  ;;  %v248_v60 = vld [vmem:[#allocation4 + $0x30] sm:$0xff]  ;;  %v243_v61 = vld [vmem:[#allocation4 + $0x8] sm:$0xff]  ;;  %v245_v62 = vld [vmem:[#allocation4 + $0x18] sm:$0xff] }
  0x30   : > { %325 = vmatpush1.msra.mxu0 %v266_v39  ;;  %426 = vmatpush1.msra.mxu1 %v268_v40  ;;  %v242_v63 = vld [vmem:[#allocation4] sm:$0xff]  ;;  %v244_v1 = vld [vmem:[#allocation4 + $0x10] sm:$0xff]  ;;  %v2805_v3 = vld [vmem:[#allocation4 + $0x3e8] sm:$0xff] }
  0x31   : > { %326 = vmatprep.subr.mxu0 %v263_v41  ;;  %427 = vmatprep.subr.mxu1 %v265_v42  ;;  %v236_v2 = vld [vmem:[%s2802_s30] sm:$0xff]  ;;  %v2807_v4 = vld [vmem:[#allocation4 + $0x3f8] sm:$0xff]  ;;  %v2811_v6 = vld [vmem:[#allocation4 + $0x3f0] sm:$0xff] }
  0x32   : > { %327 = vmatpush1.msra.mxu0 %v262_v43  ;;  %428 = vmatpush1.msra.mxu1 %v264_v44  ;;  %v2809_v5 = vld [vmem:[#allocation4 + $0x3e0] sm:$0xff]  ;;  %v2814_v7 = vld [vmem:[#allocation4 + $0x3c8] sm:$0xff]  ;;  %v2816_v8 = vld [vmem:[#allocation4 + $0x3d8] sm:$0xff] }
  0x33   : > { %328 = vmatprep.subr.mxu0 %v259_v45  ;;  %429 = vmatprep.subr.mxu1 %v261_v46  ;;  %v2819_v9 = vld [vmem:[#allocation4 + $0x3c0] sm:$0xff]  ;;  %v2821_v10 = vld [vmem:[#allocation4 + $0x3d0] sm:$0xff]  ;;  %v2825_v11 = vld [vmem:[#allocation4 + $0x3a8] sm:$0xff] }
  0x34   : > { %329 = vmatpush1.msra.mxu0 %v258_v47  ;;  %430 = vmatpush1.msra.mxu1 %v260_v48  ;;  %v2827_v12 = vld [vmem:[#allocation4 + $0x3b8] sm:$0xff]  ;;  %v2831_v13 = vld [vmem:[#allocation4 + $0x3a0] sm:$0xff]  ;;  %v2833_v14 = vld [vmem:[#allocation4 + $0x3b0] sm:$0xff] }
  0x35   : > { %330 = vmatprep.subr.mxu0 %v255_v49  ;;  %431 = vmatprep.subr.mxu1 %v257_v50  ;;  %v2837_v15 = vld [vmem:[#allocation4 + $0x388] sm:$0xff]  ;;  %v2839_v16 = vld [vmem:[#allocation4 + $0x398] sm:$0xff]  ;;  %v2843_v17 = vld [vmem:[#allocation4 + $0x380] sm:$0xff] }
  0x36   : > { %331 = vmatpush1.msra.mxu0 %v254_v51  ;;  %432 = vmatpush1.msra.mxu1 %v256_v52  ;;  %v2845_v18 = vld [vmem:[#allocation4 + $0x390] sm:$0xff]  ;;  %v2849_v19 = vld [vmem:[#allocation4 + $0x368] sm:$0xff]  ;;  %v2851_v20 = vld [vmem:[#allocation4 + $0x378] sm:$0xff] }
  0x37   : > { %332 = vmatprep.subr.mxu0 %v251_v53  ;;  %433 = vmatprep.subr.mxu1 %v253_v54  ;;  %v2855_v21 = vld [vmem:[#allocation4 + $0x360] sm:$0xff]  ;;  %v2859_v22 = vld [vmem:[#allocation4 + $0x370] sm:$0xff]  ;;  %v237_v23 = vld [vmem:[%s2802_s30 + $0x8] sm:$0xff] }
  0x38   : > { %333 = vmatpush1.msra.mxu0 %v250_v55  ;;  %434 = vmatpush1.msra.mxu1 %v252_v56  ;;  %v2864_v24 = vld [vmem:[#allocation4 + $0x348] sm:$0xff]  ;;  %v2866_v25 = vld [vmem:[#allocation4 + $0x358] sm:$0xff]  ;;  %v2870_v26 = vld [vmem:[#allocation4 + $0x340] sm:$0xff] }
  0x39   : > { %334 = vmatprep.subr.mxu0 %v247_v57  ;;  %435 = vmatprep.subr.mxu1 %v249_v58  ;;  %v2873_v27 = vld [vmem:[#allocation4 + $0x350] sm:$0xff]  ;;  %v2875_v28 = vld [vmem:[#allocation4 + $0x328] sm:$0xff]  ;;  %v2879_v29 = vld [vmem:[#allocation4 + $0x338] sm:$0xff] }
  0x3a   : > { %335 = vmatpush1.msra.mxu0 %v246_v59  ;;  %436 = vmatpush1.msra.mxu1 %v248_v60  ;;  %v2883_v30 = vld [vmem:[#allocation4 + $0x320] sm:$0xff]  ;;  %v2887_v31 = vld [vmem:[#allocation4 + $0x330] sm:$0xff]  ;;  %v2891_v33 = vld [vmem:[#allocation4 + $0x308] sm:$0xff] }
  0x3b   : > { %336 = vmatprep.subr.mxu0 %v243_v61  ;;  %437 = vmatprep.subr.mxu1 %v245_v62  ;;  %v238_v32 = vld [vmem:[%s2802_s30 + $0x10] sm:$0xff]  ;;  %v2893_v34 = vld [vmem:[#allocation4 + $0x318] sm:$0xff]  ;;  %v2897_v35 = vld [vmem:[#allocation4 + $0x300] sm:$0xff]  ;;  %v532_v62 = vlaneseq }
  0x3c   : > { %337 = vmatpush1.msra.mxu0 %v242_v63  ;;  %438 = vmatpush1.msra.mxu1 %v244_v1  ;;  %v2900_v36 = vld [vmem:[#allocation4 + $0x310] sm:$0xff]  ;;  %v2902_v37 = vld [vmem:[#allocation4 + $0x2e8] sm:$0xff]  ;;  %v2906_v38 = vld [vmem:[#allocation4 + $0x2f8] sm:$0xff] }
  0x3d   : > { %371 = vmatmul.mubr.f32.vlgmr.msra.gmra.mxu0 %v236_v2  ;;  %607 = vmatprep.subr.mxu0 %v2805_v3  ;;  %v2910_v39 = vld [vmem:[#allocation4 + $0x2e0] sm:$0xff]  ;;  %v2914_v40 = vld [vmem:[#allocation4 + $0x2f0] sm:$0xff]  ;;  %v239_v41 = vld [vmem:[%s2802_s30 + $0x18] sm:$0xff] }
  0x3e   : > { %678 = vmatprep.subr.mxu1 %v2807_v4  ;;  %472 = vmatmul.mubr.f32.vlgmr.msra.gmra.mxu1 %v236_v2  ;;  %v2918_v42 = vld [vmem:[#allocation4 + $0x2c8] sm:$0xff]  ;;  %v2920_v43 = vld [vmem:[#allocation4 + $0x2d8] sm:$0xff]  ;;  %v2924_v44 = vld [vmem:[#allocation4 + $0x2c0] sm:$0xff] }
  0x3f   : > { %608 = vmatpush1.msra.mxu0 %v2809_v5  ;;  %679 = vmatpush1.msra.mxu1 %v2811_v6  ;;  %v2927_v45 = vld [vmem:[#allocation4 + $0x2d0] sm:$0xff]  ;;  %v2929_v46 = vld [vmem:[#allocation4 + $0x2a8] sm:$0xff]  ;;  %v2933_v47 = vld [vmem:[#allocation4 + $0x2b8] sm:$0xff] }
  0x40   : > { %609 = vmatprep.subr.mxu0 %v2814_v7  ;;  %680 = vmatprep.subr.mxu1 %v2816_v8  ;;  %3826 = vst [vmem:[#allocation7_spill] sm:$0xff] %v2933_v47  ;;  %v2937_v48 = vld [vmem:[#allocation4 + $0x2a0] sm:$0xff]  ;;  %v2941_v49 = vld [vmem:[#allocation4 + $0x2b0] sm:$0xff]  ;;  %v2945_v51 = vld [vmem:[#allocation4 + $0x288] sm:$0xff] }
  0x41   : > { %610 = vmatpush1.msra.mxu0 %v2819_v9  ;;  %681 = vmatpush1.msra.mxu1 %v2821_v10  ;;  %v240_v50 = vld [vmem:[%s2802_s30 + $0x20] sm:$0xff]  ;;  %v2947_v52 = vld [vmem:[#allocation4 + $0x298] sm:$0xff]  ;;  %v2955_v54 = vld [vmem:[#allocation4 + $0x290] sm:$0xff] }
  0x42   : > { %611 = vmatprep.subr.mxu0 %v2825_v11  ;;  %682 = vmatprep.subr.mxu1 %v2827_v12  ;;  %3827 = vst [vmem:[#allocation8_spill] sm:$0xff] %v2947_v52  ;;  %v2952_v53 = vld [vmem:[#allocation4 + $0x280] sm:$0xff]  ;;  %3828 = vst [vmem:[#allocation9_spill] sm:$0xff] %v2955_v54  ;;  %v2957_v55 = vld [vmem:[#allocation4 + $0x268] sm:$0xff] }
  0x43   : > { %612 = vmatpush1.msra.mxu0 %v2831_v13  ;;  %683 = vmatpush1.msra.mxu1 %v2833_v14  ;;  %3829 = vst [vmem:[#allocation10_spill] sm:$0xff] %v2957_v55  ;;  %v2961_v56 = vld [vmem:[#allocation4 + $0x278] sm:$0xff]  ;;  %v2965_v57 = vld [vmem:[#allocation4 + $0x260] sm:$0xff]  ;;  %v2974_v58 = vld [vmem:[#allocation4 + $0x270] sm:$0xff] }
  0x44   : > { %613 = vmatprep.subr.mxu0 %v2837_v15  ;;  %684 = vmatprep.subr.mxu1 %v2839_v16  ;;  %3830 = vst [vmem:[#allocation11_spill] sm:$0xff] %v2961_v56  ;;  %3831 = vst [vmem:[#allocation12_spill] sm:$0xff] %v2965_v57  ;;  %v241_v59 = vld [vmem:[%s2802_s30 + $0x28] sm:$0xff]  ;;  %v2980_v61 = vld [vmem:[#allocation4 + $0x258] sm:$0xff] }
  0x45   : > { %614 = vmatpush1.msra.mxu0 %v2843_v17  ;;  %685 = vmatpush1.msra.mxu1 %v2845_v18  ;;  %3832 = vst [vmem:[#allocation13_spill] sm:$0xff] %v2974_v58  ;;  %v2978_v60 = vld [vmem:[#allocation4 + $0x248] sm:$0xff]  ;;  %3834 = vst [vmem:[#allocation15_spill] sm:$0xff] %v2980_v61  ;;  %v2984_v63 = vld [vmem:[#allocation4 + $0x240] sm:$0xff] }
  0x46   : > { %615 = vmatprep.subr.mxu0 %v2849_v19  ;;  %686 = vmatprep.subr.mxu1 %v2851_v20  ;;  %3833 = vst [vmem:[#allocation14_spill] sm:$0xff] %v2978_v60  ;;  %3835 = vst [vmem:[#allocation16_spill] sm:$0xff] %v2984_v63  ;;  %v2987_v1 = vld [vmem:[#allocation4 + $0x250] sm:$0xff]  ;;  %v2989_v2 = vld [vmem:[#allocation4 + $0x228] sm:$0xff] }
  0x47   : > { %376 = vmatprep.mubr.f32.mxu0 %v3763_v0  ;;  %616 = vmatpush1.msra.mxu0 %v2855_v21  ;;  %3836 = vst [vmem:[#allocation17_spill] sm:$0xff] %v2987_v1  ;;  %3837 = vst [vmem:[#allocation18_spill] sm:$0xff] %v2989_v2 }
  0x48   : > { %687 = vmatpush1.msra.mxu1 %v2859_v22  ;;  %377 = vmatmul.mubr.f32.gmra.mxu0 %v237_v23 }
  0x49   : > { %617 = vmatprep.subr.mxu0 %v2864_v24  ;;  %688 = vmatprep.subr.mxu1 %v2866_v25 }
  0x4a   : > { %477 = vmatprep.mubr.f32.mxu1 %v3763_v0  ;;  %618 = vmatpush1.msra.mxu0 %v2870_v26 }
  0x4b   : > { %689 = vmatpush1.msra.mxu1 %v2873_v27  ;;  %619 = vmatprep.subr.mxu0 %v2875_v28 }
  0x4c   : > { %478 = vmatmul.mubr.f32.gmra.mxu1 %v237_v23  ;;  %690 = vmatprep.subr.mxu1 %v2879_v29  ;;  %v2994_v23 = vld [vmem:[#allocation4 + $0x238] sm:$0xff] }
  0x4d   : > { %382 = vmatprep.mubr.f32.mxu0 %v3763_v0  ;;  %620 = vmatpush1.msra.mxu0 %v2883_v30  ;;  %3838 = vst [vmem:[#allocation19_spill] sm:$0xff] %v2994_v23 }
  0x4e   : > { %691 = vmatpush1.msra.mxu1 %v2887_v31  ;;  %383 = vmatmul.mubr.f32.gmra.mxu0 %v238_v32 }
  0x4f   : > { %621 = vmatprep.subr.mxu0 %v2891_v33  ;;  %692 = vmatprep.subr.mxu1 %v2893_v34 }
  0x50   : > { %483 = vmatprep.mubr.f32.mxu1 %v3763_v0  ;;  %622 = vmatpush1.msra.mxu0 %v2897_v35 }
  0x51   : > { %693 = vmatpush1.msra.mxu1 %v2900_v36  ;;  %623 = vmatprep.subr.mxu0 %v2902_v37 }
  0x52   : > { %484 = vmatmul.mubr.f32.gmra.mxu1 %v238_v32  ;;  %694 = vmatprep.subr.mxu1 %v2906_v38  ;;  %v2998_v32 = vld [vmem:[#allocation4 + $0x220] sm:$0xff] }
  0x53   : > { %388 = vmatprep.mubr.f32.mxu0 %v3763_v0  ;;  %624 = vmatpush1.msra.mxu0 %v2910_v39  ;;  %3839 = vst [vmem:[#allocation20_spill] sm:$0xff] %v2998_v32 }
  0x54   : > { %695 = vmatpush1.msra.mxu1 %v2914_v40  ;;  %389 = vmatmul.mubr.f32.gmra.mxu0 %v239_v41 }
  0x55   : > { %625 = vmatprep.subr.mxu0 %v2918_v42  ;;  %696 = vmatprep.subr.mxu1 %v2920_v43 }
  0x56   : > { %489 = vmatprep.mubr.f32.mxu1 %v3763_v0  ;;  %626 = vmatpush1.msra.mxu0 %v2924_v44 }
  0x57   : > { %697 = vmatpush1.msra.mxu1 %v2927_v45  ;;  %627 = vmatprep.subr.mxu0 %v2929_v46 }
  0x58   : > { %490 = vmatmul.mubr.f32.gmra.mxu1 %v239_v41  ;;  %698 = vmatprep.subr.mxu1 %v2933_v47  ;;  %v3000_v41 = vld [vmem:[#allocation4 + $0x230] sm:$0xff] }
  0x59   : > { %394 = vmatprep.mubr.f32.mxu0 %v3763_v0  ;;  %628 = vmatpush1.msra.mxu0 %v2937_v48  ;;  %3840 = vst [vmem:[#allocation21_spill] sm:$0xff] %v3000_v41 }
  0x5a   : > { %699 = vmatpush1.msra.mxu1 %v2941_v49  ;;  %395 = vmatmul.mubr.f32.gmra.mxu0 %v240_v50 }
  0x5b   : > { %629 = vmatprep.subr.mxu0 %v2945_v51  ;;  %700 = vmatprep.subr.mxu1 %v2947_v52 }
  0x5c   : > { %495 = vmatprep.mubr.f32.mxu1 %v3763_v0  ;;  %630 = vmatpush1.msra.mxu0 %v2952_v53 }
  0x5d   : > { %701 = vmatpush1.msra.mxu1 %v2955_v54  ;;  %631 = vmatprep.subr.mxu0 %v2957_v55 }
  0x5e   : > { %496 = vmatmul.mubr.f32.gmra.mxu1 %v240_v50  ;;  %702 = vmatprep.subr.mxu1 %v2961_v56  ;;  %v3002_v50 = vand.u32 127, %v532_v62  ;;  %v3020_v62 = vld [vmem:[#allocation4 + $0x210] sm:$0xff] }
  0x5f   : > { %400 = vmatprep.mubr.f32.mxu0 %v3763_v0  ;;  %632 = vmatpush1.msra.mxu0 %v2965_v57  ;;  %3845 = vst [vmem:[#allocation26_spill] sm:$0xff] %v3020_v62 }
  0x60   : > { %703 = vmatpush1.msra.mxu1 %v2974_v58  ;;  %401 = vmatmul.mubr.f32.gmra.mxu0 %v241_v59  ;;  %3841 = vst [vmem:[#allocation22_spill] sm:$0xff] %v3002_v50  ;;  %v3006_v58 = vld [vmem:[#allocation4 + $0x208] sm:$0xff]  ;;  %vm534_vm0 = vcmp.lt.s32.totalorder %v3002_v50, 6 }
  0x61   : > { %633 = vmatprep.subr.mxu0 %v2978_v60  ;;  %704 = vmatprep.subr.mxu1 %v2980_v61  ;;  %3842 = vst [vmem:[#allocation23_spill] sm:$0xff] %v3006_v58  ;;  %v3008_v60 = vld [vmem:[#allocation4 + $0x218] sm:$0xff]  ;;  %v3346_v50 = vld [vmem:[#allocation4 + $0x2a8] sm:$0xff] }
  0x62   : > { %501 = vmatprep.mubr.f32.mxu1 %v3763_v0  ;;  %634 = vmatpush1.msra.mxu0 %v2984_v63  ;;  %3843 = vst [vmem:[#allocation24_spill] sm:$0xff] %v3008_v60  ;;  %v3016_v0 = vld [vmem:[#allocation4 + $0x200] sm:$0xff] }
  0x63   : > { %705 = vmatpush1.msra.mxu1 %v2987_v1  ;;  %635 = vmatprep.subr.mxu0 %v2989_v2  ;;  %3844 = vst [vmem:[#allocation25_spill] sm:$0xff] %v3016_v0  ;;  %v535_v2 = vld [vmem:[%s3013_s9] sm:$0xff] }
  0x64   : > { %502 = vmatmul.mubr.f32.gmra.mxu1 %v241_v59  ;;  %706 = vmatprep.subr.mxu1 %v2994_v23  ;;  %v3846_v59 = vmov 0.0  }
  0x65   : > { %636 = vmatpush1.msra.mxu0 %v2998_v32  ;;  %707 = vmatpush1.msra.mxu1 %v3000_v41 }
  0x66   : > { %637 = vmatprep.subr.mxu0 %v3006_v58  ;;  %708 = vmatprep.subr.mxu1 %v3008_v60 }
  0x67   : > { %638 = vmatpush1.msra.mxu0 %v3016_v0  ;;  %671 = vmatprep.mubr.f32.mxu0 %v3846_v59 }
  0x68   : > { %709 = vmatpush1.msra.mxu1 %v3020_v62  ;;  %742 = vmatprep.mubr.f32.mxu1 %v3846_v59 }
  0x69   : > { %2395 = vmatmul.mubr.msk.f32.vlgmr.msra.gmra.mxu0 %vm534_vm0, %v535_v2  ;;  %2396 = vmatmul.mubr.msk.f32.vlgmr.msra.gmra.mxu1 %vm534_vm0, %v535_v2  ;;  %v3847_v2 = vld [vmem:[#allocation13_spill] sm:$0xff] }
  0x6a   : > { %846 = vmatprep.subr.mxu0 %v2805_v3  ;;  %917 = vmatprep.subr.mxu1 %v2807_v4 }
  0x6b   : > { %847 = vmatpush1.msra.mxu0 %v2809_v5  ;;  %918 = vmatpush1.msra.mxu1 %v2811_v6 }
  0x6c   : > { %848 = vmatprep.subr.mxu0 %v2814_v7  ;;  %919 = vmatprep.subr.mxu1 %v2816_v8 }
  0x6d   : > { %849 = vmatpush1.msra.mxu0 %v2819_v9  ;;  %920 = vmatpush1.msra.mxu1 %v2821_v10 }
  0x6e   : > { %850 = vmatprep.subr.mxu0 %v2825_v11  ;;  %921 = vmatprep.subr.mxu1 %v2827_v12 }
  0x6f   : > { %851 = vmatpush1.msra.mxu0 %v2831_v13  ;;  %922 = vmatpush1.msra.mxu1 %v2833_v14 }
  0x70   : > { %852 = vmatprep.subr.mxu0 %v2837_v15  ;;  %923 = vmatprep.subr.mxu1 %v2839_v16 }
  0x71   : > { %853 = vmatpush1.msra.mxu0 %v2843_v17  ;;  %924 = vmatpush1.msra.mxu1 %v2845_v18 }
  0x72   : > { %854 = vmatprep.subr.mxu0 %v2849_v19  ;;  %925 = vmatprep.subr.mxu1 %v2851_v20 }
  0x73   : > { %855 = vmatpush1.msra.mxu0 %v2855_v21  ;;  %926 = vmatpush1.msra.mxu1 %v2859_v22 }
  0x74   : > { %856 = vmatprep.subr.mxu0 %v2864_v24  ;;  %927 = vmatprep.subr.mxu1 %v2866_v25 }
  0x75   : > { %857 = vmatpush1.msra.mxu0 %v2870_v26  ;;  %928 = vmatpush1.msra.mxu1 %v2873_v27 }
  0x76   : > { %858 = vmatprep.subr.mxu0 %v2875_v28  ;;  %929 = vmatprep.subr.mxu1 %v2879_v29 }
  0x77   : > { %859 = vmatpush1.msra.mxu0 %v2883_v30  ;;  %930 = vmatpush1.msra.mxu1 %v2887_v31 }
  0x78   : > { %860 = vmatprep.subr.mxu0 %v2891_v33  ;;  %931 = vmatprep.subr.mxu1 %v2893_v34 }
  0x79   : > { %861 = vmatpush1.msra.mxu0 %v2897_v35  ;;  %932 = vmatpush1.msra.mxu1 %v2900_v36 }
  0x7a   : > { %862 = vmatprep.subr.mxu0 %v2902_v37  ;;  %933 = vmatprep.subr.mxu1 %v2906_v38 }
  0x7b   : > { %863 = vmatpush1.msra.mxu0 %v2910_v39  ;;  %934 = vmatpush1.msra.mxu1 %v2914_v40 }
  0x7c   : > { %864 = vmatprep.subr.mxu0 %v2918_v42  ;;  %935 = vmatprep.subr.mxu1 %v2920_v43 }
  0x7d   : > { %865 = vmatpush1.msra.mxu0 %v2924_v44  ;;  %936 = vmatpush1.msra.mxu1 %v2927_v45 }
  0x7e   : > { %866 = vmatprep.subr.mxu0 %v2929_v46  ;;  %937 = vmatprep.subr.mxu1 %v2933_v47  ;;  %v3848_v47 = vld [vmem:[#allocation14_spill] sm:$0xff] }
  0x7f   : > { %867 = vmatpush1.msra.mxu0 %v2937_v48  ;;  %938 = vmatpush1.msra.mxu1 %v2941_v49 }
  0x80   : > { %868 = vmatprep.subr.mxu0 %v2945_v51  ;;  %939 = vmatprep.subr.mxu1 %v2947_v52  ;;  %v3849_v52 = vld [vmem:[#allocation18_spill] sm:$0xff] }
  0x81   : > { %869 = vmatpush1.msra.mxu0 %v2952_v53  ;;  %940 = vmatpush1.msra.mxu1 %v2955_v54 }
  0x82   : > { %870 = vmatprep.subr.mxu0 %v2957_v55  ;;  %941 = vmatprep.subr.mxu1 %v2961_v56 }
  0x83   : > { %871 = vmatpush1.msra.mxu0 %v2965_v57  ;;  %942 = vmatpush1.msra.mxu1 %v3847_v2 }
  0x84   : > { %872 = vmatprep.subr.mxu0 %v3848_v47  ;;  %943 = vmatprep.subr.mxu1 %v2980_v61 }
  0x85   : > { %873 = vmatpush1.msra.mxu0 %v2984_v63  ;;  %944 = vmatpush1.msra.mxu1 %v2987_v1 }
  0x86   : > { %874 = vmatprep.subr.mxu0 %v3849_v52  ;;  %945 = vmatprep.subr.mxu1 %v2994_v23 }
  0x87   : > { %875 = vmatpush1.msra.mxu0 %v2998_v32  ;;  %946 = vmatpush1.msra.mxu1 %v3000_v41 }
  0x88   : > { %876 = vmatprep.subr.mxu0 %v3006_v58  ;;  %947 = vmatprep.subr.mxu1 %v3008_v60 }
  0x89   : > { %877 = vmatpush1.msra.mxu0 %v3016_v0  ;;  %910 = vmatprep.mubr.f32.mxu0 %v3846_v59 }
  0x8a   : > { %948 = vmatpush1.msra.mxu1 %v3020_v62  ;;  %981 = vmatprep.mubr.f32.mxu1 %v3846_v59 }
  0x8b   : > { %1085 = vmatprep.subr.mxu0 %v2805_v3  ;;  %1156 = vmatprep.subr.mxu1 %v2807_v4 }
  0xfd   : > { %v372_v23 = vpop.f32.mrf.mxu0 }
  0xfe   : > { %v473_v32 = vpop.f32.mrf.mxu1 }
  0xff   : > { %v374_v52 = vpop.f32.mrf.mxu0 }
 0x100   : > { %v475_v58 = vpop.f32.mrf.mxu1 }
 0x108   : > { %v3102_v41 = vpop.f32.mrf.mxu0 }
 0x109   : > { %3850 = vst [vmem:[#allocation27_spill] sm:$0xff] %v3102_v41 }
 0x10a   : > { %v3104_v1 = vpop.f32.mrf.mxu0 }
 0x10b   : > { %3851 = vst [vmem:[#allocation28_spill] sm:$0xff] %v3104_v1 }
 0x10c   : > { %v3106_v60 = vpop.f32.mrf.mxu1 }
 0x10d   : > { %3852 = vst [vmem:[#allocation29_spill] sm:$0xff] %v3106_v60 }
 0x10e   : > { %v3108_v0 = vpop.f32.mrf.mxu0  ;;  %v3110_v63 = vpop.f32.mrf.mxu1 }
 0x10f   : > { %3853 = vst [vmem:[#allocation30_spill] sm:$0xff] %v3108_v0  ;;  %3854 = vst [vmem:[#allocation31_spill] sm:$0xff] %v3110_v63 }
 0x110   : > { %v3112_v62 = vpop.f32.mrf.mxu0 }
 0x111   : > { %3855 = vst [vmem:[#allocation32_spill] sm:$0xff] %v3112_v62 }
 0x112   : > { %v3114_v59 = vpop.f32.mrf.mxu1 }
 0x113   : > { %3856 = vst [vmem:[#allocation33_spill] sm:$0xff] %v3114_v59 }
 0x114   : > { %v3116_v3 = vpop.f32.mrf.mxu0  ;;  %v3118_v4 = vpop.f32.mrf.mxu1 }
 0x115   : > { %3857 = vst [vmem:[#allocation34_spill] sm:$0xff] %v3116_v3  ;;  %3858 = vst [vmem:[#allocation35_spill] sm:$0xff] %v3118_v4 }
 0x116   : > { %v3120_v61 = vpop.f32.mrf.mxu0 }
 0x117   : > { %3859 = vst [vmem:[#allocation36_spill] sm:$0xff] %v3120_v61 }
 0x118   : > { %v3122_v41 = vpop.f32.mrf.mxu1 }
 0x119   : > { %3860 = vst [vmem:[#allocation37_spill] sm:$0xff] %v3122_v41 }
 0x11a   : > { %v3124_v47 = vpop.f32.mrf.mxu1  ;;  %v3126_v1 = vpop.f32.mrf.mxu0 }
 0x11b   : > { %3861 = vst [vmem:[#allocation38_spill] sm:$0xff] %v3124_v47  ;;  %3862 = vst [vmem:[#allocation39_spill] sm:$0xff] %v3126_v1 }
 0x11c   : > { %v3130_v0 = vpop.f32.mrf.mxu0 }
 0x11d   : > { %3864 = vst [vmem:[#allocation41_spill] sm:$0xff] %v3130_v0 }
 0x11e   : > { %v3128_v60 = vpop.f32.mrf.mxu1 }
 0x11f   : > { %3863 = vst [vmem:[#allocation40_spill] sm:$0xff] %v3128_v60 }
 0x120   : > { %v3132_v63 = vpop.f32.mrf.mxu1  ;;  %v3134_v62 = vpop.f32.mrf.mxu0 }
 0x121   : > { %3865 = vst [vmem:[#allocation42_spill] sm:$0xff] %v3132_v63  ;;  %3866 = vst [vmem:[#allocation43_spill] sm:$0xff] %v3134_v62 }
 0x122   : > { %v3138_v3 = vpop.f32.mrf.mxu0 }
 0x123   : > { %3868 = vst [vmem:[#allocation45_spill] sm:$0xff] %v3138_v3 }
 0x124   : > { %v3136_v59 = vpop.f32.mrf.mxu1 }
 0x125   : > { %3867 = vst [vmem:[#allocation44_spill] sm:$0xff] %v3136_v59 }
 0x126   : > { %v3140_v61 = vpop.f32.mrf.mxu1 }
 0x127   : > { %3869 = vst [vmem:[#allocation46_spill] sm:$0xff] %v3140_v61  ;;  %v3348_v61 = vld [vmem:[#allocation4 + $0x2b8] sm:$0xff] }
 0x129   : > { %v673_v4 = vpop.f32.mrf.mxu0  ;;  %v744_v60 = vpop.f32.mrf.mxu1 }
 0x12a   : > { %v749_v41 = vadd.f32 %v673_v4, %v372_v23  ;;  %v751_v55 = vadd.f32 %v744_v60, %v473_v32  ;;  %v537_v23 = vld [vmem:[%s3013_s9 + $0x8] sm:$0xff] }
 0x12b   : > { %v675_v2 = vpop.f32.mrf.mxu0  ;;  %v746_v0 = vpop.f32.mrf.mxu1 }
 0x12c   : > { %v2397_v47 = vmul.f32 -1.442695, %v749_v41  ;;  %v750_v57 = vadd.f32 %v675_v2, %v374_v52  ;;  %v752_v63 = vadd.f32 %v746_v0, %v475_v58 }
 0x12e   : > { %2568 = vpow2.f32 %v2397_v47  ;;  %v2398_v1 = vmul.f32 -1.442695, %v750_v57  ;;  %v2399_v56 = vmul.f32 -1.442695, %v752_v63  ;;  %v538_v47 = vsel %vm534_vm0, %v537_v23, 0.0 }
 0x130   : > { %2570 = vpow2.f32 %v2398_v1 }
 0x131   : > { %2572 = vpow2.f32 %v2399_v56 }
 0x13b   : > { %v2569_v62 = vpop.eup %2568 }
 0x13c   : > { %v756_v59 = vadd.f32 1.0, %v2569_v62 }
 0x13d   : > { %v2571_v54 = vpop.eup %2570 }
 0x13e   : > { %2574 = vrcp.f32 %v756_v59  ;;  %v762_v3 = vadd.f32 1.0, %v2571_v54  ;;  %v2573_v41 = vpop.eup %2572 }
 0x13f   : > { %2576 = vtanh.f32 %v751_v55  ;;  %v769_v2 = vadd.f32 1.0, %v2573_v41 }
 0x140   : > { %2578 = vrcp.f32 %v762_v3 }
 0x141   : > { %2580 = vrcp.f32 %v769_v2  ;;  %v3242_v2 = vld [vmem:[#allocation4 + $0x3c8] sm:$0xff] }
 0x14b   : > { %v2575_v52 = vpop.eup %2574 }
 0x14c   : > { %v2577_v57 = vpop.eup %2576 }
 0x14d   : > { %v2579_v1 = vpop.eup %2578  ;;  %v773_v0 = vmul.f32 %v2577_v57, %v2575_v52  ;;  %v3230_v52 = vld [vmem:[#allocation4 + $0x3e8] sm:$0xff]  ;;  %v3236_v57 = vld [vmem:[#allocation4 + $0x3e0] sm:$0xff] }
 0x14e   : > { %v772_v58 = vmul.f32 %v2579_v1, %v538_v47  ;;  %v2581_v56 = vpop.eup %2580  ;;  %v3232_v47 = vld [vmem:[#allocation4 + $0x3f8] sm:$0xff]  ;;  %v3238_v1 = vld [vmem:[#allocation4 + $0x3f0] sm:$0xff] }
 0x150   : > { %v3145_v63 = vadd.f32 %v773_v0, %v772_v58  ;;  %v3244_v0 = vld [vmem:[#allocation4 + $0x3d8] sm:$0xff]  ;;  %v3248_v58 = vld [vmem:[#allocation4 + $0x3c0] sm:$0xff] }
 0x152   : > { %2582 = vtanh.f32 %v3145_v63 }
 0x15f   : > { %v2583_v54 = vpop.eup %2582 }
 0x160   : > { %v3148_v55 = vmul.f32 %v2583_v54, %v2581_v56  ;;  %v3254_v56 = vld [vmem:[#allocation4 + $0x3a8] sm:$0xff]  ;;  %v3256_v54 = vld [vmem:[#allocation4 + $0x3b8] sm:$0xff] }
 0x162   : > { %3870 = vst [vmem:[#allocation47_spill] sm:$0xff] %v3148_v55  ;;  %911 = vmatmul.mubr.f32.vlgmr.msra.gmra.mxu0 %v3148_v55  ;;  %982 = vmatmul.mubr.f32.vlgmr.msra.gmra.mxu1 %v3148_v55  ;;  %v3354_v55 = vld [vmem:[#allocation4 + $0x2b0] sm:$0xff] }
 0x163   : > { %1086 = vmatpush1.msra.mxu0 %v2809_v5  ;;  %1157 = vmatpush1.msra.mxu1 %v2811_v6  ;;  %v3871_v5 = vld [vmem:[#allocation7_spill] sm:$0xff]  ;;  %v3872_v6 = vld [vmem:[#allocation8_spill] sm:$0xff] }
 0x164   : > { %1087 = vmatprep.subr.mxu0 %v2814_v7  ;;  %1158 = vmatprep.subr.mxu1 %v2816_v8  ;;  %v3873_v7 = vld [vmem:[#allocation9_spill] sm:$0xff]  ;;  %v3874_v8 = vld [vmem:[#allocation10_spill] sm:$0xff] }
 0x165   : > { %1088 = vmatpush1.msra.mxu0 %v2819_v9  ;;  %1159 = vmatpush1.msra.mxu1 %v2821_v10  ;;  %v3875_v9 = vld [vmem:[#allocation11_spill] sm:$0xff]  ;;  %v3876_v10 = vld [vmem:[#allocation12_spill] sm:$0xff] }
 0x166   : > { %1089 = vmatprep.subr.mxu0 %v2825_v11  ;;  %1160 = vmatprep.subr.mxu1 %v2827_v12  ;;  %v3877_v11 = vld [vmem:[#allocation13_spill] sm:$0xff]  ;;  %v3878_v12 = vld [vmem:[#allocation14_spill] sm:$0xff] }
 0x167   : > { %1090 = vmatpush1.msra.mxu0 %v2831_v13  ;;  %1161 = vmatpush1.msra.mxu1 %v2833_v14  ;;  %v3879_v13 = vld [vmem:[#allocation15_spill] sm:$0xff]  ;;  %v3880_v14 = vld [vmem:[#allocation16_spill] sm:$0xff] }
 0x168   : > { %1091 = vmatprep.subr.mxu0 %v2837_v15  ;;  %1162 = vmatprep.subr.mxu1 %v2839_v16  ;;  %v3881_v15 = vld [vmem:[#allocation17_spill] sm:$0xff]  ;;  %v3882_v16 = vld [vmem:[#allocation18_spill] sm:$0xff] }
 0x169   : > { %1092 = vmatpush1.msra.mxu0 %v2843_v17  ;;  %1163 = vmatpush1.msra.mxu1 %v2845_v18  ;;  %v3883_v17 = vld [vmem:[#allocation19_spill] sm:$0xff]  ;;  %v3884_v18 = vld [vmem:[#allocation20_spill] sm:$0xff] }
 0x16a   : > { %1093 = vmatprep.subr.mxu0 %v2849_v19  ;;  %1164 = vmatprep.subr.mxu1 %v2851_v20  ;;  %v3885_v19 = vld [vmem:[#allocation21_spill] sm:$0xff]  ;;  %v3886_v20 = vld [vmem:[#allocation23_spill] sm:$0xff] }
 0x16b   : > { %1094 = vmatpush1.msra.mxu0 %v2855_v21  ;;  %1165 = vmatpush1.msra.mxu1 %v2859_v22  ;;  %v3887_v21 = vld [vmem:[#allocation24_spill] sm:$0xff]  ;;  %v3888_v22 = vld [vmem:[#allocation25_spill] sm:$0xff] }
 0x16c   : > { %1095 = vmatprep.subr.mxu0 %v2864_v24  ;;  %1166 = vmatprep.subr.mxu1 %v2866_v25  ;;  %v3889_v24 = vmov 0.0   ;;  %v3890_v25 = vld [vmem:[#allocation26_spill] sm:$0xff] }
 0x16d   : > { %1096 = vmatpush1.msra.mxu0 %v2870_v26  ;;  %1167 = vmatpush1.msra.mxu1 %v2873_v27  ;;  %v3891_v27 = vld [vmem:[#allocation27_spill] sm:$0xff] }
 0x16e   : > { %1097 = vmatprep.subr.mxu0 %v2875_v28  ;;  %1168 = vmatprep.subr.mxu1 %v2879_v29 }
 0x16f   : > { %1098 = vmatpush1.msra.mxu0 %v2883_v30  ;;  %1169 = vmatpush1.msra.mxu1 %v2887_v31  ;;  %v3892_v31 = vld [vmem:[#allocation28_spill] sm:$0xff] }
 0x170   : > { %1099 = vmatprep.subr.mxu0 %v2891_v33  ;;  %1170 = vmatprep.subr.mxu1 %v2893_v34 }
 0x171   : > { %1100 = vmatpush1.msra.mxu0 %v2897_v35  ;;  %1171 = vmatpush1.msra.mxu1 %v2900_v36 }
 0x172   : > { %1101 = vmatprep.subr.mxu0 %v2902_v37  ;;  %1172 = vmatprep.subr.mxu1 %v2906_v38  ;;  %v3893_v37 = vld [vmem:[#allocation31_spill] sm:$0xff] }
 0x173   : > { %1102 = vmatpush1.msra.mxu0 %v2910_v39  ;;  %1173 = vmatpush1.msra.mxu1 %v2914_v40 }
 0x174   : > { %1103 = vmatprep.subr.mxu0 %v2918_v42  ;;  %1174 = vmatprep.subr.mxu1 %v2920_v43  ;;  %v3894_v42 = vld [vmem:[#allocation29_spill] sm:$0xff] }
 0x175   : > { %1104 = vmatpush1.msra.mxu0 %v2924_v44  ;;  %1175 = vmatpush1.msra.mxu1 %v2927_v45 }
 0x176   : > { %1105 = vmatprep.subr.mxu0 %v2929_v46  ;;  %1176 = vmatprep.subr.mxu1 %v3871_v5  ;;  %v3260_v5 = vld [vmem:[#allocation4 + $0x3a0] sm:$0xff] }
 0x177   : > { %1106 = vmatpush1.msra.mxu0 %v2937_v48  ;;  %1177 = vmatpush1.msra.mxu1 %v2941_v49 }
 0x178   : > { %1107 = vmatprep.subr.mxu0 %v2945_v51  ;;  %1178 = vmatprep.subr.mxu1 %v3872_v6  ;;  %v3262_v6 = vld [vmem:[#allocation4 + $0x3b0] sm:$0xff] }
 0x179   : > { %1108 = vmatpush1.msra.mxu0 %v2952_v53  ;;  %1179 = vmatpush1.msra.mxu1 %v3873_v7 }
 0x17a   : > { %1109 = vmatprep.subr.mxu0 %v3874_v8  ;;  %1180 = vmatprep.subr.mxu1 %v3875_v9 }
 0x17b   : > { %1110 = vmatpush1.msra.mxu0 %v3876_v10  ;;  %1181 = vmatpush1.msra.mxu1 %v3877_v11 }
 0x17c   : > { %1111 = vmatprep.subr.mxu0 %v3878_v12  ;;  %1182 = vmatprep.subr.mxu1 %v3879_v13 }
 0x17d   : > { %1112 = vmatpush1.msra.mxu0 %v3880_v14  ;;  %1183 = vmatpush1.msra.mxu1 %v3881_v15 }
 0x17e   : > { %1113 = vmatprep.subr.mxu0 %v3882_v16  ;;  %1184 = vmatprep.subr.mxu1 %v3883_v17 }
 0x17f   : > { %1114 = vmatpush1.msra.mxu0 %v3884_v18  ;;  %1185 = vmatpush1.msra.mxu1 %v3885_v19 }
 0x180   : > { %1115 = vmatprep.subr.mxu0 %v3886_v20  ;;  %1186 = vmatprep.subr.mxu1 %v3887_v21 }
 0x181   : > { %1116 = vmatpush1.msra.mxu0 %v3888_v22  ;;  %1149 = vmatprep.mubr.f32.mxu0 %v3889_v24 }
 0x182   : > { %1187 = vmatpush1.msra.mxu1 %v3890_v25  ;;  %1220 = vmatprep.mubr.f32.mxu1 %v3889_v24 }
 0x183   : > { %1324 = vmatprep.subr.mxu0 %v3230_v52  ;;  %1395 = vmatprep.subr.mxu1 %v3232_v47 }
 0x222   : > { %v912_v26 = vpop.f32.mrf.mxu0  ;;  %v983_v34 = vpop.f32.mrf.mxu1 }
 0x223   : > { %v988_v28 = vadd.f32 %v912_v26, %v3891_v27  ;;  %v990_v43 = vadd.f32 %v983_v34, %v3894_v42  ;;  %v3266_v26 = vld [vmem:[#allocation4 + $0x388] sm:$0xff]  ;;  %v3268_v27 = vld [vmem:[#allocation4 + $0x398] sm:$0xff]  ;;  %v3286_v34 = vld [vmem:[#allocation4 + $0x370] sm:$0xff] }
 0x224   : > { %v914_v29 = vpop.f32.mrf.mxu0  ;;  %v985_v36 = vpop.f32.mrf.mxu1  ;;  %v3308_v42 = vld [vmem:[#allocation4 + $0x320] sm:$0xff] }
 0x225   : > { %v2400_v30 = vmul.f32 -1.442695, %v988_v28  ;;  %v989_v33 = vadd.f32 %v914_v29, %v3892_v31  ;;  %v991_v38 = vadd.f32 %v985_v36, %v3893_v37  ;;  %v3272_v28 = vld [vmem:[#allocation4 + $0x380] sm:$0xff]  ;;  %v3274_v29 = vld [vmem:[#allocation4 + $0x390] sm:$0xff]  ;;  %v3280_v31 = vld [vmem:[#allocation4 + $0x378] sm:$0xff] }
 0x226   : > { %v3292_v36 = vld [vmem:[#allocation4 + $0x358] sm:$0xff]  ;;  %v3296_v37 = vld [vmem:[#allocation4 + $0x340] sm:$0xff] }
 0x227   : > { %2584 = vpow2.f32 %v2400_v30  ;;  %v2401_v35 = vmul.f32 -1.442695, %v989_v33  ;;  %v2402_v39 = vmul.f32 -1.442695, %v991_v38  ;;  %v3278_v30 = vld [vmem:[#allocation4 + $0x368] sm:$0xff]  ;;  %v3284_v33 = vld [vmem:[#allocation4 + $0x360] sm:$0xff] }
 0x228   : > { %v3298_v38 = vld [vmem:[#allocation4 + $0x350] sm:$0xff] }
 0x229   : > { %2586 = vpow2.f32 %v2401_v35  ;;  %v3290_v35 = vld [vmem:[#allocation4 + $0x348] sm:$0xff] }
 0x22a   : > { %2588 = vpow2.f32 %v2402_v39  ;;  %v3302_v39 = vld [vmem:[#allocation4 + $0x328] sm:$0xff] }
 0x234   : > { %v2585_v40 = vpop.eup %2584 }
 0x235   : > { %v995_v44 = vadd.f32 1.0, %v2585_v40  ;;  %v3304_v40 = vld [vmem:[#allocation4 + $0x338] sm:$0xff] }
 0x236   : > { %v2587_v45 = vpop.eup %2586 }
 0x237   : > { %2590 = vrcp.f32 %v995_v44  ;;  %v1001_v46 = vadd.f32 1.0, %v2587_v45  ;;  %v2589_v48 = vpop.eup %2588  ;;  %v3314_v44 = vld [vmem:[#allocation4 + $0x308] sm:$0xff]  ;;  %v3316_v45 = vld [vmem:[#allocation4 + $0x318] sm:$0xff] }
 0x238   : > { %2592 = vtanh.f32 %v990_v43  ;;  %v1008_v32 = vadd.f32 1.0, %v2589_v48  ;;  %v3310_v43 = vld [vmem:[#allocation4 + $0x330] sm:$0xff] }
 0x239   : > { %2594 = vrcp.f32 %v1001_v46  ;;  %v3318_v46 = vld [vmem:[#allocation4 + $0x300] sm:$0xff]  ;;  %v3322_v48 = vld [vmem:[#allocation4 + $0x310] sm:$0xff] }
 0x23a   : > { %2596 = vrcp.f32 %v1008_v32  ;;  %v3332_v32 = vld [vmem:[#allocation4 + $0x2f0] sm:$0xff] }
 0x244   : > { %v2591_v49 = vpop.eup %2590 }
 0x245   : > { %v2593_v51 = vpop.eup %2592 }
 0x246   : > { %v2595_v60 = vpop.eup %2594  ;;  %v1012_v62 = vmul.f32 %v2593_v51, %v2591_v49  ;;  %v3324_v49 = vld [vmem:[#allocation4 + $0x2e8] sm:$0xff]  ;;  %v3326_v51 = vld [vmem:[#allocation4 + $0x2f8] sm:$0xff] }
 0x247   : > { %v1011_v59 = vmul.f32 %v2595_v60, %v3145_v63  ;;  %v2597_v4 = vpop.eup %2596  ;;  %v3250_v63 = vld [vmem:[#allocation4 + $0x3d0] sm:$0xff]  ;;  %v3330_v60 = vld [vmem:[#allocation4 + $0x2e0] sm:$0xff] }
 0x248   : > { %3896 = vst [vmem:[#allocation8_spill] sm:$0xff] %v3330_v60 }
 0x249   : > { %v3221_v3 = vadd.f32 %v1012_v62, %v1011_v59  ;;  %v3334_v62 = vld [vmem:[#allocation4 + $0x2c8] sm:$0xff]  ;;  %v3338_v59 = vld [vmem:[#allocation4 + $0x2d8] sm:$0xff] }
 0x24b   : > { %2598 = vtanh.f32 %v3221_v3 }
 0x258   : > { %v2599_v23 = vpop.eup %2598 }
 0x259   : > { %v3224_v41 = vmul.f32 %v2599_v23, %v2597_v4  ;;  %v3340_v4 = vld [vmem:[#allocation4 + $0x2c0] sm:$0xff]  ;;  %v3342_v23 = vld [vmem:[#allocation4 + $0x2d0] sm:$0xff] }
 0x25b   : > { %3895 = vst [vmem:[#allocation7_spill] sm:$0xff] %v3224_v41  ;;  %1150 = vmatmul.mubr.f32.vlgmr.msra.gmra.mxu0 %v3224_v41  ;;  %1221 = vmatmul.mubr.f32.vlgmr.msra.gmra.mxu1 %v3224_v41  ;;  %v3352_v41 = vld [vmem:[#allocation4 + $0x2a0] sm:$0xff] }
 0x25c   : > { %1388 = vmatprep.mubr.f32.mxu0 %v3889_v24  ;;  %1459 = vmatprep.mubr.f32.mxu1 %v3889_v24  ;;  %v3358_v24 = vld [vmem:[#allocation4 + $0x288] sm:$0xff] }
 0x25d   : > { %1325 = vmatpush1.msra.mxu0 %v3236_v57  ;;  %1396 = vmatpush1.msra.mxu1 %v3238_v1 }
 0x25e   : > { %1326 = vmatprep.subr.mxu0 %v3242_v2  ;;  %1397 = vmatprep.subr.mxu1 %v3244_v0 }
 0x25f   : > { %1327 = vmatpush1.msra.mxu0 %v3248_v58  ;;  %1398 = vmatpush1.msra.mxu1 %v3250_v63 }
 0x260   : > { %1328 = vmatprep.subr.mxu0 %v3254_v56  ;;  %1399 = vmatprep.subr.mxu1 %v3256_v54 }
 0x261   : > { %1329 = vmatpush1.msra.mxu0 %v3260_v5  ;;  %1400 = vmatpush1.msra.mxu1 %v3262_v6 }
 0x262   : > { %1330 = vmatprep.subr.mxu0 %v3266_v26  ;;  %1401 = vmatprep.subr.mxu1 %v3268_v27 }
 0x263   : > { %1331 = vmatpush1.msra.mxu0 %v3272_v28  ;;  %1402 = vmatpush1.msra.mxu1 %v3274_v29 }
 0x264   : > { %1332 = vmatprep.subr.mxu0 %v3278_v30  ;;  %1403 = vmatprep.subr.mxu1 %v3280_v31 }
 0x265   : > { %1333 = vmatpush1.msra.mxu0 %v3284_v33  ;;  %1404 = vmatpush1.msra.mxu1 %v3286_v34 }
 0x266   : > { %1334 = vmatprep.subr.mxu0 %v3290_v35  ;;  %1405 = vmatprep.subr.mxu1 %v3292_v36 }
 0x267   : > { %1335 = vmatpush1.msra.mxu0 %v3296_v37  ;;  %1406 = vmatpush1.msra.mxu1 %v3298_v38 }
 0x268   : > { %1336 = vmatprep.subr.mxu0 %v3302_v39  ;;  %1407 = vmatprep.subr.mxu1 %v3304_v40 }
 0x269   : > { %1337 = vmatpush1.msra.mxu0 %v3308_v42  ;;  %1408 = vmatpush1.msra.mxu1 %v3310_v43 }
 0x26a   : > { %1338 = vmatprep.subr.mxu0 %v3314_v44  ;;  %1409 = vmatprep.subr.mxu1 %v3316_v45 }
 0x26b   : > { %1339 = vmatpush1.msra.mxu0 %v3318_v46  ;;  %1410 = vmatpush1.msra.mxu1 %v3322_v48 }
 0x26c   : > { %1340 = vmatprep.subr.mxu0 %v3324_v49  ;;  %1411 = vmatprep.subr.mxu1 %v3326_v51 }
 0x26d   : > { %1341 = vmatpush1.msra.mxu0 %v3330_v60  ;;  %1412 = vmatpush1.msra.mxu1 %v3332_v32  ;;  %v3360_v60 = vld [vmem:[#allocation4 + $0x298] sm:$0xff] }
 0x26e   : > { %1342 = vmatprep.subr.mxu0 %v3334_v62  ;;  %1413 = vmatprep.subr.mxu1 %v3338_v59 }
 0x26f   : > { %1343 = vmatpush1.msra.mxu0 %v3340_v4  ;;  %1414 = vmatpush1.msra.mxu1 %v3342_v23 }
 0x270   : > { %1344 = vmatprep.subr.mxu0 %v3346_v50  ;;  %1415 = vmatprep.subr.mxu1 %v3348_v61 }
 0x271   : > { %1345 = vmatpush1.msra.mxu0 %v3352_v41  ;;  %1416 = vmatpush1.msra.mxu1 %v3354_v55 }
 0x272   : > { %1346 = vmatprep.subr.mxu0 %v3358_v24  ;;  %1417 = vmatprep.subr.mxu1 %v3360_v60 }
 0x273   : > { %1347 = vmatpush1.msra.mxu0 %v2952_v53  ;;  %1418 = vmatpush1.msra.mxu1 %v3873_v7  ;;  %v3897_v7 = vld [vmem:[#allocation30_spill] sm:$0xff] }
 0x274   : > { %1348 = vmatprep.subr.mxu0 %v3874_v8  ;;  %1419 = vmatprep.subr.mxu1 %v3875_v9 }
 0x275   : > { %1349 = vmatpush1.msra.mxu0 %v3876_v10  ;;  %1420 = vmatpush1.msra.mxu1 %v3877_v11  ;;  %v3898_v11 = vld [vmem:[#allocation32_spill] sm:$0xff] }
 0x276   : > { %1350 = vmatprep.subr.mxu0 %v3878_v12  ;;  %1421 = vmatprep.subr.mxu1 %v3879_v13 }
 0x277   : > { %1351 = vmatpush1.msra.mxu0 %v3880_v14  ;;  %1422 = vmatpush1.msra.mxu1 %v3881_v15 }
 0x278   : > { %1352 = vmatprep.subr.mxu0 %v3882_v16  ;;  %1423 = vmatprep.subr.mxu1 %v3883_v17  ;;  %v3899_v16 = vld [vmem:[#allocation35_spill] sm:$0xff] }
 0x279   : > { %1353 = vmatpush1.msra.mxu0 %v3884_v18  ;;  %1424 = vmatpush1.msra.mxu1 %v3885_v19 }
 0x27a   : > { %1354 = vmatprep.subr.mxu0 %v3886_v20  ;;  %1425 = vmatprep.subr.mxu1 %v3887_v21  ;;  %v3900_v20 = vld [vmem:[#allocation33_spill] sm:$0xff] }
 0x27b   : > { %1355 = vmatpush1.msra.mxu0 %v3888_v22  ;;  %1426 = vmatpush1.msra.mxu1 %v3890_v25 }
 0x27c   : > { %1563 = vmatprep.subr.mxu0 %v3230_v52  ;;  %1634 = vmatprep.subr.mxu1 %v3232_v47 }
 0x31b   : > { %v1151_v53 = vpop.f32.mrf.mxu0  ;;  %v1222_v13 = vpop.f32.mrf.mxu1 }
 0x31c   : > { %v1227_v8 = vadd.f32 %v1151_v53, %v3897_v7  ;;  %v1229_v21 = vadd.f32 %v1222_v13, %v3900_v20  ;;  %v3448_v20 = vld [vmem:[#allocation4 + $0x290] sm:$0xff] }
 0x31d   : > { %v1153_v9 = vpop.f32.mrf.mxu0  ;;  %v1224_v15 = vpop.f32.mrf.mxu1  ;;  %3904 = vst [vmem:[#allocation10_spill] sm:$0xff] %v3448_v20 }
 0x31e   : > { %v2403_v10 = vmul.f32 -1.442695, %v1227_v8  ;;  %v1228_v12 = vadd.f32 %v1153_v9, %v3898_v11  ;;  %v1230_v17 = vadd.f32 %v1224_v15, %v3899_v16 }
 0x320   : > { %2600 = vpow2.f32 %v2403_v10  ;;  %v2404_v14 = vmul.f32 -1.442695, %v1228_v12  ;;  %v2405_v18 = vmul.f32 -1.442695, %v1230_v17 }
 0x322   : > { %2602 = vpow2.f32 %v2404_v14 }
 0x323   : > { %2604 = vpow2.f32 %v2405_v18  ;;  %v3903_v18 = vmov 0.0  }
 0x32d   : > { %v2601_v19 = vpop.eup %2600 }
 0x32e   : > { %v1234_v22 = vadd.f32 1.0, %v2601_v19  ;;  %v3446_v19 = vld [vmem:[#allocation4 + $0x280] sm:$0xff] }
 0x32f   : > { %v2603_v25 = vpop.eup %2602 }
 0x330   : > { %2606 = vrcp.f32 %v1234_v22  ;;  %v1240_v53 = vadd.f32 1.0, %v2603_v25  ;;  %v2605_v7 = vpop.eup %2604  ;;  %v3454_v22 = vld [vmem:[#allocation4 + $0x278] sm:$0xff]  ;;  %v3456_v25 = vld [vmem:[#allocation4 + $0x260] sm:$0xff] }
 0x331   : > { %2608 = vtanh.f32 %v1229_v21  ;;  %v1247_v11 = vadd.f32 1.0, %v2605_v7  ;;  %v3450_v21 = vld [vmem:[#allocation4 + $0x268] sm:$0xff]  ;;  %3906 = vst [vmem:[#allocation12_spill] sm:$0xff] %v3454_v22  ;;  %3907 = vst [vmem:[#allocation13_spill] sm:$0xff] %v3456_v25 }
 0x332   : > { %2610 = vrcp.f32 %v1240_v53  ;;  %3905 = vst [vmem:[#allocation11_spill] sm:$0xff] %v3450_v21  ;;  %v3458_v53 = vld [vmem:[#allocation4 + $0x270] sm:$0xff]  ;;  %v3462_v7 = vld [vmem:[#allocation4 + $0x248] sm:$0xff] }
 0x333   : > { %2612 = vrcp.f32 %v1247_v11  ;;  %3908 = vst [vmem:[#allocation14_spill] sm:$0xff] %v3458_v53  ;;  %3909 = vst [vmem:[#allocation15_spill] sm:$0xff] %v3462_v7  ;;  %v3472_v11 = vld [vmem:[#allocation4 + $0x228] sm:$0xff] }
 0x334   : > { %3913 = vst [vmem:[#allocation19_spill] sm:$0xff] %v3472_v11 }
 0x33d   : > { %v2607_v8 = vpop.eup %2606 }
 0x33e   : > { %v2609_v9 = vpop.eup %2608 }
 0x33f   : > { %v2611_v10 = vpop.eup %2610  ;;  %v1251_v12 = vmul.f32 %v2609_v9, %v2607_v8  ;;  %v3464_v8 = vld [vmem:[#allocation4 + $0x258] sm:$0xff]  ;;  %v3466_v9 = vld [vmem:[#allocation4 + $0x240] sm:$0xff] }
 0x340   : > { %v1250_v14 = vmul.f32 %v2611_v10, %v3221_v3  ;;  %v2613_v13 = vpop.eup %2612  ;;  %v3902_v3 = vld [vmem:[#allocation8_spill] sm:$0xff]  ;;  %3910 = vst [vmem:[#allocation16_spill] sm:$0xff] %v3464_v8  ;;  %3911 = vst [vmem:[#allocation17_spill] sm:$0xff] %v3466_v9  ;;  %v3470_v10 = vld [vmem:[#allocation4 + $0x250] sm:$0xff] }
 0x341   : > { %3912 = vst [vmem:[#allocation18_spill] sm:$0xff] %v3470_v10 }
 0x342   : > { %v3393_v15 = vadd.f32 %v1251_v12, %v1250_v14  ;;  %v3474_v12 = vld [vmem:[#allocation4 + $0x238] sm:$0xff]  ;;  %v3478_v14 = vld [vmem:[#allocation4 + $0x220] sm:$0xff] }
 0x343   : > { %3914 = vst [vmem:[#allocation20_spill] sm:$0xff] %v3474_v12  ;;  %3915 = vst [vmem:[#allocation21_spill] sm:$0xff] %v3478_v14 }
 0x344   : > { %2614 = vtanh.f32 %v3393_v15 }
 0x351   : > { %v2615_v16 = vpop.eup %2614 }
 0x352   : > { %v3396_v17 = vmul.f32 %v2615_v16, %v2613_v13  ;;  %v3480_v13 = vld [vmem:[#allocation4 + $0x230] sm:$0xff]  ;;  %v3484_v16 = vld [vmem:[#allocation4 + $0x208] sm:$0xff] }
 0x353   : > { %3916 = vst [vmem:[#allocation23_spill] sm:$0xff] %v3480_v13  ;;  %3917 = vst [vmem:[#allocation24_spill] sm:$0xff] %v3484_v16 }
 0x354   : > { %3901 = vst [vmem:[#allocation9_spill] sm:$0xff] %v3396_v17  ;;  %1389 = vmatmul.mubr.f32.vlgmr.msra.gmra.mxu0 %v3396_v17  ;;  %1460 = vmatmul.mubr.f32.vlgmr.msra.gmra.mxu1 %v3396_v17  ;;  %v3486_v17 = vld [vmem:[#allocation4 + $0x218] sm:$0xff] }
 0x355   : > { %1564 = vmatpush1.msra.mxu0 %v3236_v57  ;;  %1635 = vmatpush1.msra.mxu1 %v3238_v1  ;;  %3918 = vst [vmem:[#allocation25_spill] sm:$0xff] %v3486_v17 }
 0x356   : > { %1565 = vmatprep.subr.mxu0 %v3242_v2  ;;  %1636 = vmatprep.subr.mxu1 %v3244_v0 }
 0x357   : > { %1566 = vmatpush1.msra.mxu0 %v3248_v58  ;;  %1637 = vmatpush1.msra.mxu1 %v3250_v63 }
 0x358   : > { %1567 = vmatprep.subr.mxu0 %v3254_v56  ;;  %1638 = vmatprep.subr.mxu1 %v3256_v54 }
 0x359   : > { %1568 = vmatpush1.msra.mxu0 %v3260_v5  ;;  %1639 = vmatpush1.msra.mxu1 %v3262_v6 }
 0x35a   : > { %1569 = vmatprep.subr.mxu0 %v3266_v26  ;;  %1640 = vmatprep.subr.mxu1 %v3268_v27 }
 0x35b   : > { %1570 = vmatpush1.msra.mxu0 %v3272_v28  ;;  %1641 = vmatpush1.msra.mxu1 %v3274_v29 }
 0x35c   : > { %1571 = vmatprep.subr.mxu0 %v3278_v30  ;;  %1642 = vmatprep.subr.mxu1 %v3280_v31 }
 0x35d   : > { %1572 = vmatpush1.msra.mxu0 %v3284_v33  ;;  %1643 = vmatpush1.msra.mxu1 %v3286_v34 }
 0x35e   : > { %1573 = vmatprep.subr.mxu0 %v3290_v35  ;;  %1644 = vmatprep.subr.mxu1 %v3292_v36 }
 0x35f   : > { %1574 = vmatpush1.msra.mxu0 %v3296_v37  ;;  %1645 = vmatpush1.msra.mxu1 %v3298_v38 }
 0x360   : > { %1575 = vmatprep.subr.mxu0 %v3302_v39  ;;  %1646 = vmatprep.subr.mxu1 %v3304_v40 }
 0x361   : > { %1576 = vmatpush1.msra.mxu0 %v3308_v42  ;;  %1647 = vmatpush1.msra.mxu1 %v3310_v43 }
 0x362   : > { %1577 = vmatprep.subr.mxu0 %v3314_v44  ;;  %1648 = vmatprep.subr.mxu1 %v3316_v45 }
 0x363   : > { %1578 = vmatpush1.msra.mxu0 %v3318_v46  ;;  %1649 = vmatpush1.msra.mxu1 %v3322_v48 }
 0x364   : > { %1579 = vmatprep.subr.mxu0 %v3324_v49  ;;  %1650 = vmatprep.subr.mxu1 %v3326_v51 }
 0x365   : > { %1580 = vmatpush1.msra.mxu0 %v3902_v3  ;;  %1651 = vmatpush1.msra.mxu1 %v3332_v32 }
 0x366   : > { %1581 = vmatprep.subr.mxu0 %v3334_v62  ;;  %1652 = vmatprep.subr.mxu1 %v3338_v59 }
 0x367   : > { %1582 = vmatpush1.msra.mxu0 %v3340_v4  ;;  %1653 = vmatpush1.msra.mxu1 %v3342_v23 }
 0x368   : > { %1583 = vmatprep.subr.mxu0 %v3346_v50  ;;  %1654 = vmatprep.subr.mxu1 %v3348_v61 }
 0x369   : > { %1584 = vmatpush1.msra.mxu0 %v3352_v41  ;;  %1655 = vmatpush1.msra.mxu1 %v3354_v55 }
 0x36a   : > { %1585 = vmatprep.subr.mxu0 %v3358_v24  ;;  %1656 = vmatprep.subr.mxu1 %v3360_v60 }
 0x36b   : > { %1627 = vmatprep.mubr.f32.mxu0 %v3903_v18  ;;  %1698 = vmatprep.mubr.f32.mxu1 %v3903_v18  ;;  %v3490_v18 = vld [vmem:[#allocation4 + $0x200] sm:$0xff] }
 0x36c   : > { %1586 = vmatpush1.msra.mxu0 %v3446_v19  ;;  %1657 = vmatpush1.msra.mxu1 %v3448_v20  ;;  %3919 = vst [vmem:[#allocation26_spill] sm:$0xff] %v3490_v18 }
 0x36d   : > { %1587 = vmatprep.subr.mxu0 %v3450_v21  ;;  %1658 = vmatprep.subr.mxu1 %v3454_v22  ;;  %v3924_v21 = vld [vmem:[#allocation37_spill] sm:$0xff] }
 0x36e   : > { %1588 = vmatpush1.msra.mxu0 %v3456_v25  ;;  %1659 = vmatpush1.msra.mxu1 %v3458_v53  ;;  %v3923_v25 = vld [vmem:[#allocation38_spill] sm:$0xff] }
 0x36f   : > { %1589 = vmatprep.subr.mxu0 %v3462_v7  ;;  %1660 = vmatprep.subr.mxu1 %v3464_v8  ;;  %v3492_v7 = vld [vmem:[#allocation4 + $0x210] sm:$0xff] }
 0x370   : > { %1590 = vmatpush1.msra.mxu0 %v3466_v9  ;;  %1661 = vmatpush1.msra.mxu1 %v3470_v10  ;;  %3920 = vst [vmem:[#allocation27_spill] sm:$0xff] %v3492_v7 }
 0x371   : > { %1591 = vmatprep.subr.mxu0 %v3472_v11  ;;  %1662 = vmatprep.subr.mxu1 %v3474_v12  ;;  %v3921_v11 = vld [vmem:[#allocation34_spill] sm:$0xff] }
 0x372   : > { %1592 = vmatpush1.msra.mxu0 %v3478_v14  ;;  %1663 = vmatpush1.msra.mxu1 %v3480_v13  ;;  %v3922_v14 = vld [vmem:[#allocation36_spill] sm:$0xff] }
 0x373   : > { %1593 = vmatprep.subr.mxu0 %v3484_v16  ;;  %1664 = vmatprep.subr.mxu1 %v3486_v17 }
 0x374   : > { %1594 = vmatpush1.msra.mxu0 %v3490_v18  ;;  %1665 = vmatpush1.msra.mxu1 %v3492_v7 }
 0x375   : > { %1802 = vmatprep.subr.mxu0 %v3230_v52  ;;  %1873 = vmatprep.subr.mxu1 %v3232_v47 }
 0x414   : > { %v1390_v12 = vpop.f32.mrf.mxu0  ;;  %v1461_v13 = vpop.f32.mrf.mxu1 }
 0x415   : > { %v1466_v10 = vadd.f32 %v1390_v12, %v3921_v11  ;;  %v1468_v52 = vadd.f32 %v1461_v13, %v3924_v21  ;;  %v1993_v13 = vld [vmem:[%s3757_s3 + $0x70] sm:$0xff] }
 0x416   : > { %v1392_v9 = vpop.f32.mrf.mxu0  ;;  %v1463_v17 = vpop.f32.mrf.mxu1 }
 0x417   : > { %v2406_v8 = vmul.f32 -1.442695, %v1466_v10  ;;  %v1467_v53 = vadd.f32 %v1392_v9, %v3922_v14  ;;  %v1469_v18 = vadd.f32 %v1463_v17, %v3923_v25 }
 0x419   : > { %2616 = vpow2.f32 %v2406_v8  ;;  %v2407_v16 = vmul.f32 -1.442695, %v1467_v53  ;;  %v2408_v22 = vmul.f32 -1.442695, %v1469_v18 }
 0x41b   : > { %2618 = vpow2.f32 %v2407_v16 }
 0x41c   : > { %2620 = vpow2.f32 %v2408_v22 }
 0x426   : > { %v2617_v7 = vpop.eup %2616 }
 0x427   : > { %v1473_v20 = vadd.f32 1.0, %v2617_v7 }
 0x428   : > { %v2619_v47 = vpop.eup %2618 }
 0x429   : > { %2622 = vrcp.f32 %v1473_v20  ;;  %v1479_v11 = vadd.f32 1.0, %v2619_v47  ;;  %v2621_v10 = vpop.eup %2620  ;;  %v1992_v47 = vld [vmem:[%s3757_s3 + $0x68] sm:$0xff] }
 0x42a   : > { %2624 = vtanh.f32 %v1468_v52  ;;  %v1486_v53 = vadd.f32 1.0, %v2621_v10  ;;  %v3947_v52 = vld [vmem:[#allocation47_spill] sm:$0xff]  ;;  %v1990_v10 = vld [vmem:[%s3757_s3 + $0x58] sm:$0xff] }
 0x42b   : > { %2626 = vrcp.f32 %v1479_v11  ;;  %v1991_v11 = vld [vmem:[%s3757_s3 + $0x60] sm:$0xff] }
 0x42c   : > { %2628 = vrcp.f32 %v1486_v53  ;;  %v1986_v53 = vld [vmem:[%s3757_s3 + $0x38] sm:$0xff] }
 0x436   : > { %v2623_v9 = vpop.eup %2622 }
 0x437   : > { %v2625_v8 = vpop.eup %2624 }
 0x438   : > { %v2627_v12 = vpop.eup %2626  ;;  %v1490_v14 = vmul.f32 %v2625_v8, %v2623_v9  ;;  %v1989_v9 = vld [vmem:[%s3757_s3 + $0x50] sm:$0xff]  ;;  %v1988_v8 = vld [vmem:[%s3757_s3 + $0x48] sm:$0xff] }
 0x439   : > { %v1489_v16 = vmul.f32 %v2627_v12, %v3393_v15  ;;  %v2629_v18 = vpop.eup %2628  ;;  %v1987_v12 = vld [vmem:[%s3757_s3 + $0x40] sm:$0xff] }
 0x43b   : > { %v3507_v17 = vadd.f32 %v1490_v14, %v1489_v16  ;;  %v1985_v14 = vld [vmem:[%s3757_s3 + $0x30] sm:$0xff]  ;;  %v1984_v16 = vld [vmem:[%s3757_s3 + $0x28] sm:$0xff] }
 0x43d   : > { %2630 = vtanh.f32 %v3507_v17 }
 0x44a   : > { %v2631_v21 = vpop.eup %2630 }
 0x44b   : > { %v3510_v22 = vmul.f32 %v2631_v21, %v2629_v18  ;;  %v1982_v18 = vld [vmem:[%s3757_s3 + $0x18] sm:$0xff]  ;;  %v1981_v21 = vld [vmem:[%s3757_s3 + $0x10] sm:$0xff] }
 0x44d   : > { %1628 = vmatmul.mubr.f32.vlgmr.msra.gmra.mxu0 %v3510_v22  ;;  %1699 = vmatmul.mubr.f32.vlgmr.msra.gmra.mxu1 %v3510_v22 }
 0x44e   : > { %1803 = vmatpush1.msra.mxu0 %v3236_v57  ;;  %1874 = vmatpush1.msra.mxu1 %v3238_v1  ;;  %v3925_v57 = vld [vmem:[#allocation10_spill] sm:$0xff]  ;;  %v3926_v1 = vld [vmem:[#allocation11_spill] sm:$0xff] }
 0x44f   : > { %1804 = vmatprep.subr.mxu0 %v3242_v2  ;;  %1875 = vmatprep.subr.mxu1 %v3244_v0  ;;  %v3927_v2 = vld [vmem:[#allocation12_spill] sm:$0xff]  ;;  %v3928_v0 = vld [vmem:[#allocation13_spill] sm:$0xff] }
 0x450   : > { %1805 = vmatpush1.msra.mxu0 %v3248_v58  ;;  %1876 = vmatpush1.msra.mxu1 %v3250_v63  ;;  %v3934_v58 = vld [vmem:[#allocation19_spill] sm:$0xff]  ;;  %v3935_v63 = vld [vmem:[#allocation20_spill] sm:$0xff] }
 0x451   : > { %1806 = vmatprep.subr.mxu0 %v3254_v56  ;;  %1877 = vmatprep.subr.mxu1 %v3256_v54  ;;  %v3936_v56 = vld [vmem:[#allocation21_spill] sm:$0xff]  ;;  %v3937_v54 = vld [vmem:[#allocation23_spill] sm:$0xff] }
 0x452   : > { %1807 = vmatpush1.msra.mxu0 %v3260_v5  ;;  %1878 = vmatpush1.msra.mxu1 %v3262_v6  ;;  %v3938_v5 = vld [vmem:[#allocation24_spill] sm:$0xff]  ;;  %v3939_v6 = vld [vmem:[#allocation25_spill] sm:$0xff] }
 0x453   : > { %1808 = vmatprep.subr.mxu0 %v3266_v26  ;;  %1879 = vmatprep.subr.mxu1 %v3268_v27  ;;  %v3940_v26 = vld [vmem:[#allocation26_spill] sm:$0xff]  ;;  %v3941_v27 = vmov 0.0  }
 0x454   : > { %1809 = vmatpush1.msra.mxu0 %v3272_v28  ;;  %1880 = vmatpush1.msra.mxu1 %v3274_v29  ;;  %v3942_v28 = vld [vmem:[#allocation27_spill] sm:$0xff]  ;;  %v1994_v29 = vld [vmem:[%s3757_s3 + $0x78] sm:$0xff] }
 0x455   : > { %1810 = vmatprep.subr.mxu0 %v3278_v30  ;;  %1881 = vmatprep.subr.mxu1 %v3280_v31  ;;  %v3943_v31 = vld [vmem:[#allocation39_spill] sm:$0xff] }
 0x456   : > { %1811 = vmatpush1.msra.mxu0 %v3284_v33  ;;  %1882 = vmatpush1.msra.mxu1 %v3286_v34 }
 0x457   : > { %1812 = vmatprep.subr.mxu0 %v3290_v35  ;;  %1883 = vmatprep.subr.mxu1 %v3292_v36  ;;  %v3944_v36 = vld [vmem:[#allocation41_spill] sm:$0xff] }
 0x458   : > { %1813 = vmatpush1.msra.mxu0 %v3296_v37  ;;  %1884 = vmatpush1.msra.mxu1 %v3298_v38 }
 0x459   : > { %1814 = vmatprep.subr.mxu0 %v3302_v39  ;;  %1885 = vmatprep.subr.mxu1 %v3304_v40 }
 0x45a   : > { %1815 = vmatpush1.msra.mxu0 %v3308_v42  ;;  %1886 = vmatpush1.msra.mxu1 %v3310_v43  ;;  %v3945_v42 = vld [vmem:[#allocation42_spill] sm:$0xff] }
 0x45b   : > { %1816 = vmatprep.subr.mxu0 %v3314_v44  ;;  %1887 = vmatprep.subr.mxu1 %v3316_v45 }
 0x45c   : > { %1817 = vmatpush1.msra.mxu0 %v3318_v46  ;;  %1888 = vmatpush1.msra.mxu1 %v3322_v48  ;;  %v3946_v46 = vld [vmem:[#allocation40_spill] sm:$0xff] }
 0x45d   : > { %1818 = vmatprep.subr.mxu0 %v3324_v49  ;;  %1889 = vmatprep.subr.mxu1 %v3326_v51 }
 0x45e   : > { %1819 = vmatpush1.msra.mxu0 %v3902_v3  ;;  %1890 = vmatpush1.msra.mxu1 %v3332_v32 }
 0x45f   : > { %1820 = vmatprep.subr.mxu0 %v3334_v62  ;;  %1891 = vmatprep.subr.mxu1 %v3338_v59 }
 0x460   : > { %1821 = vmatpush1.msra.mxu0 %v3340_v4  ;;  %1892 = vmatpush1.msra.mxu1 %v3342_v23 }
 0x461   : > { %1822 = vmatprep.subr.mxu0 %v3346_v50  ;;  %1893 = vmatprep.subr.mxu1 %v3348_v61  ;;  %v3929_v50 = vld [vmem:[#allocation14_spill] sm:$0xff]  ;;  %v3930_v61 = vld [vmem:[#allocation15_spill] sm:$0xff] }
 0x462   : > { %1823 = vmatpush1.msra.mxu0 %v3352_v41  ;;  %1894 = vmatpush1.msra.mxu1 %v3354_v55  ;;  %v3931_v41 = vld [vmem:[#allocation16_spill] sm:$0xff]  ;;  %v3932_v55 = vld [vmem:[#allocation17_spill] sm:$0xff] }
 0x463   : > { %1824 = vmatprep.subr.mxu0 %v3358_v24  ;;  %1895 = vmatprep.subr.mxu1 %v3360_v60  ;;  %v3933_v24 = vld [vmem:[#allocation18_spill] sm:$0xff] }
 0x464   : > { %1825 = vmatpush1.msra.mxu0 %v3446_v19  ;;  %1896 = vmatpush1.msra.mxu1 %v3925_v57  ;;  %v1980_v57 = vld [vmem:[%s3757_s3 + $0x8] sm:$0xff] }
 0x465   : > { %1826 = vmatprep.subr.mxu0 %v3926_v1  ;;  %1897 = vmatprep.subr.mxu1 %v3927_v2  ;;  %v1979_v1 = vld [vmem:[%s3757_s3] sm:$0xff] }
 0x466   : > { %1827 = vmatpush1.msra.mxu0 %v3928_v0  ;;  %1898 = vmatpush1.msra.mxu1 %v3929_v50  ;;  %v3948_v2 = vld [vmem:[#allocation7_spill] sm:$0xff]  ;;  %v3949_v0 = vld [vmem:[#allocation9_spill] sm:$0xff] }
 0x467   : > { %1828 = vmatprep.subr.mxu0 %v3930_v61  ;;  %1899 = vmatprep.subr.mxu1 %v3931_v41  ;;  %v2116_v50 = vld [vmem:[%s3757_s3 + $0x100] sm:$0xff]  ;;  %v2115_v61 = vld [vmem:[%s3757_s3 + $0xf8] sm:$0xff]  ;;  %v2114_v41 = vld [vmem:[%s3757_s3 + $0xf0] sm:$0xff] }
 0x468   : > { %1829 = vmatpush1.msra.mxu0 %v3932_v55  ;;  %1900 = vmatpush1.msra.mxu1 %v3933_v24  ;;  %v2112_v55 = vld [vmem:[%s3757_s3 + $0xe0] sm:$0xff]  ;;  %v2111_v24 = vld [vmem:[%s3757_s3 + $0xd8] sm:$0xff] }
 0x469   : > { %1830 = vmatprep.subr.mxu0 %v3934_v58  ;;  %1901 = vmatprep.subr.mxu1 %v3935_v63  ;;  %v2110_v58 = vld [vmem:[%s3757_s3 + $0xd0] sm:$0xff]  ;;  %v2109_v63 = vld [vmem:[%s3757_s3 + $0xc8] sm:$0xff] }
 0x46a   : > { %1831 = vmatpush1.msra.mxu0 %v3936_v56  ;;  %1902 = vmatpush1.msra.mxu1 %v3937_v54  ;;  %v2108_v56 = vld [vmem:[%s3757_s3 + $0xc0] sm:$0xff]  ;;  %v2107_v54 = vld [vmem:[%s3757_s3 + $0xb8] sm:$0xff] }
 0x46b   : > { %1832 = vmatprep.subr.mxu0 %v3938_v5  ;;  %1903 = vmatprep.subr.mxu1 %v3939_v6  ;;  %v2106_v5 = vld [vmem:[%s3757_s3 + $0xb0] sm:$0xff]  ;;  %v2105_v6 = vld [vmem:[%s3757_s3 + $0xa8] sm:$0xff] }
 0x46c   : > { %1833 = vmatpush1.msra.mxu0 %v3940_v26  ;;  %1866 = vmatprep.mubr.f32.mxu0 %v3941_v27  ;;  %v2104_v26 = vld [vmem:[%s3757_s3 + $0xa0] sm:$0xff] }
 0x46d   : > { %1904 = vmatpush1.msra.mxu1 %v3942_v28  ;;  %1937 = vmatprep.mubr.f32.mxu1 %v3941_v27  ;;  %v2103_v27 = vld [vmem:[%s3757_s3 + $0x98] sm:$0xff]  ;;  %v2102_v28 = vld [vmem:[%s3757_s3 + $0x90] sm:$0xff] }
 0x46e   : > { %2464 = vmatprep.subr.mxu0 %v1994_v29  ;;  %2505 = vmatprep.subr.mxu1 %v2116_v50 }
 0x50d   : > { %v1629_v30 = vpop.f32.mrf.mxu0  ;;  %v1700_v38 = vpop.f32.mrf.mxu1 }
 0x50e   : > { %v1705_v33 = vadd.f32 %v1629_v30, %v3943_v31  ;;  %v1707_v48 = vadd.f32 %v1700_v38, %v3946_v46  ;;  %v3950_v31 = vld [vmem:[#allocation43_spill] sm:$0xff]  ;;  %v3953_v46 = vld [vmem:[#allocation44_spill] sm:$0xff] }
 0x50f   : > { %v1631_v34 = vpop.f32.mrf.mxu0  ;;  %v1702_v40 = vpop.f32.mrf.mxu1 }
 0x510   : > { %v2409_v35 = vmul.f32 -1.442695, %v1705_v33  ;;  %v1706_v37 = vadd.f32 %v1631_v34, %v3944_v36  ;;  %v1708_v43 = vadd.f32 %v1702_v40, %v3945_v42  ;;  %v3951_v36 = vld [vmem:[#allocation45_spill] sm:$0xff]  ;;  %v3952_v42 = vld [vmem:[#allocation46_spill] sm:$0xff] }
 0x512   : > { %2632 = vpow2.f32 %v2409_v35  ;;  %v2410_v39 = vmul.f32 -1.442695, %v1706_v37  ;;  %v2411_v44 = vmul.f32 -1.442695, %v1708_v43 }
 0x514   : > { %2634 = vpow2.f32 %v2410_v39 }
 0x515   : > { %2636 = vpow2.f32 %v2411_v44 }
 0x51f   : > { %v2633_v45 = vpop.eup %2632 }
 0x520   : > { %v1712_v49 = vadd.f32 1.0, %v2633_v45 }
 0x521   : > { %v2635_v51 = vpop.eup %2634 }
 0x522   : > { %2638 = vrcp.f32 %v1712_v49  ;;  %v1718_v60 = vadd.f32 1.0, %v2635_v51  ;;  %v2637_v32 = vpop.eup %2636 }
 0x523   : > { %2640 = vtanh.f32 %v1707_v48  ;;  %v1725_v23 = vadd.f32 1.0, %v2637_v32  ;;  %v2415_v32 = vld [vmem:[%s3757_s3 + $0x80] ss:$0 sm:$0xff] }
 0x524   : > { %2642 = vrcp.f32 %v1718_v60 }
 0x525   : > { %2644 = vrcp.f32 %v1725_v23 }
 0x52f   : > { %v2639_v62 = vpop.eup %2638 }
 0x530   : > { %v2641_v59 = vpop.eup %2640 }
 0x531   : > { %v2643_v4 = vpop.eup %2642  ;;  %v1729_v15 = vmul.f32 %v2641_v59, %v2639_v62 }
 0x532   : > { %v1728_v3 = vmul.f32 %v2643_v4, %v3507_v17  ;;  %v2645_v20 = vpop.eup %2644  ;;  %v1983_v17 = vld [vmem:[%s3757_s3 + $0x20] sm:$0xff] }
 0x534   : > { %v3586_v19 = vadd.f32 %v1729_v15, %v1728_v3 }
 0x536   : > { %2646 = vtanh.f32 %v3586_v19 }
 0x543   : > { %v2647_v25 = vpop.eup %2646 }
 0x544   : > { %v1732_v7 = vmul.f32 %v2647_v25, %v2645_v20 }
 0x546   : > { %1867 = vmatmul.mubr.f32.vlgmr.msra.gmra.mxu0 %v1732_v7  ;;  %1938 = vmatmul.mubr.f32.vlgmr.msra.gmra.mxu1 %v1732_v7 }
 0x547   : > { %2465 = vmatpush3.msra.mxu0 %v1994_v29  ;;  %2496 = vmatprep.mubr.f32.mxu0 %v3947_v52  ;;  %v2101_v29 = vld [vmem:[%s3757_s3 + $0x88] sm:$0xff] }
 0x548   : > { %2466 = vmatprep.subr.mxu0 %v1993_v13  ;;  %2506 = vmatpush3.msra.mxu1 %v2116_v50 }
 0x549   : > { %2467 = vmatpush3.msra.mxu0 %v1993_v13  ;;  %2507 = vmatprep.subr.mxu1 %v2115_v61 }
 0x54a   : > { %2468 = vmatprep.subr.mxu0 %v1992_v47  ;;  %2508 = vmatpush3.msra.mxu1 %v2115_v61 }
 0x54b   : > { %2469 = vmatpush3.msra.mxu0 %v1992_v47  ;;  %2509 = vmatprep.subr.mxu1 %v2114_v41 }
 0x54c   : > { %2470 = vmatprep.subr.mxu0 %v1991_v11  ;;  %2510 = vmatpush3.msra.mxu1 %v2114_v41 }
 0x54d   : > { %2471 = vmatpush3.msra.mxu0 %v1991_v11 }
 0x54e   : > { %2472 = vmatprep.subr.mxu0 %v1990_v10 }
 0x54f   : > { %2473 = vmatpush3.msra.mxu0 %v1990_v10 }
 0x550   : > { %2474 = vmatprep.subr.mxu0 %v1989_v9 }
 0x551   : > { %2475 = vmatpush3.msra.mxu0 %v1989_v9 }
 0x552   : > { %2476 = vmatprep.subr.mxu0 %v1988_v8 }
 0x553   : > { %2477 = vmatpush3.msra.mxu0 %v1988_v8 }
 0x554   : > { %2478 = vmatprep.subr.mxu0 %v1987_v12 }
 0x555   : > { %2479 = vmatpush3.msra.mxu0 %v1987_v12 }
 0x556   : > { %2480 = vmatprep.subr.mxu0 %v1986_v53 }
 0x557   : > { %2481 = vmatpush3.msra.mxu0 %v1986_v53 }
 0x558   : > { %2482 = vmatprep.subr.mxu0 %v1985_v14 }
 0x559   : > { %2483 = vmatpush3.msra.mxu0 %v1985_v14 }
 0x55a   : > { %2484 = vmatprep.subr.mxu0 %v1984_v16 }
 0x55b   : > { %2485 = vmatpush3.msra.mxu0 %v1984_v16 }
 0x55c   : > { %2486 = vmatprep.subr.mxu0 %v1983_v17 }
 0x55d   : > { %2487 = vmatpush3.msra.mxu0 %v1983_v17 }
 0x55e   : > { %2488 = vmatprep.subr.mxu0 %v1982_v18 }
 0x55f   : > { %2489 = vmatpush3.msra.mxu0 %v1982_v18 }
 0x560   : > { %2490 = vmatprep.subr.mxu0 %v1981_v21 }
 0x561   : > { %2491 = vmatpush3.msra.mxu0 %v1981_v21  ;;  %v2416_v21 = vld [vmem:[%s3757_s3 + $0x81] ss:$0 sm:$0xff] }
 0x562   : > { %2492 = vmatprep.subr.mxu0 %v1980_v57 }
 0x563   : > { %2493 = vmatpush3.msra.mxu0 %v1980_v57 }
 0x564   : > { %2494 = vmatprep.subr.mxu0 %v1979_v1 }
 0x565   : > { %2495 = vmatpush3.msra.mxu0 %v1979_v1 }
 0x566   : > { %2497 = vmatmul.mubr.f32.vlgmr.msra.gmra.mxu0 %v3948_v2 }
 0x567   : > { %2499 = vmatprep.mubr.f32.mxu0 %v3949_v0 }
 0x56a   : > { %2500 = vmatmul.mubr.f32.gmra.mxu0 %v3510_v22  ;;  %v2113_v22 = vld [vmem:[%s3757_s3 + $0xe8] sm:$0xff] }
 0x56b   : > { %2502 = vmatprep.mubr.f32.mxu0 %v1732_v7  ;;  %2511 = vmatprep.subr.mxu1 %v2113_v22 }
 0x56c   : > { %2512 = vmatpush3.msra.mxu1 %v2113_v22 }
 0x56d   : > { %2513 = vmatprep.subr.mxu1 %v2112_v55 }
 0x56e   : > { %2514 = vmatpush3.msra.mxu1 %v2112_v55 }
 0x56f   : > { %2515 = vmatprep.subr.mxu1 %v2111_v24 }
 0x570   : > { %2516 = vmatpush3.msra.mxu1 %v2111_v24 }
 0x571   : > { %2517 = vmatprep.subr.mxu1 %v2110_v58 }
 0x572   : > { %2518 = vmatpush3.msra.mxu1 %v2110_v58 }
 0x573   : > { %2519 = vmatprep.subr.mxu1 %v2109_v63 }
 0x574   : > { %2520 = vmatpush3.msra.mxu1 %v2109_v63 }
 0x575   : > { %2521 = vmatprep.subr.mxu1 %v2108_v56 }
 0x576   : > { %2522 = vmatpush3.msra.mxu1 %v2108_v56 }
 0x577   : > { %2523 = vmatprep.subr.mxu1 %v2107_v54 }
 0x578   : > { %2524 = vmatpush3.msra.mxu1 %v2107_v54 }
 0x579   : > { %2525 = vmatprep.subr.mxu1 %v2106_v5 }
 0x57a   : > { %2526 = vmatpush3.msra.mxu1 %v2106_v5 }
 0x57b   : > { %2527 = vmatprep.subr.mxu1 %v2105_v6 }
 0x57c   : > { %2528 = vmatpush3.msra.mxu1 %v2105_v6 }
 0x57d   : > { %2529 = vmatprep.subr.mxu1 %v2104_v26 }
 0x57e   : > { %2530 = vmatpush3.msra.mxu1 %v2104_v26 }
 0x57f   : > { %2531 = vmatprep.subr.mxu1 %v2103_v27 }
 0x580   : > { %2532 = vmatpush3.msra.mxu1 %v2103_v27 }
 0x581   : > { %2533 = vmatprep.subr.mxu1 %v2102_v28 }
 0x582   : > { %2534 = vmatpush3.msra.mxu1 %v2102_v28 }
 0x583   : > { %2535 = vmatprep.subr.mxu1 %v2101_v29 }
 0x584   : > { %2536 = vmatpush3.msra.mxu1 %v2101_v29 }
 0x606   : > { %v1868_v30 = vpop.f32.mrf.mxu0  ;;  %v1939_v38 = vpop.f32.mrf.mxu1 }
 0x607   : > { %v1944_v33 = vadd.f32 %v1868_v30, %v3950_v31  ;;  %v1946_v48 = vadd.f32 %v1939_v38, %v3953_v46 }
 0x608   : > { %v1870_v34 = vpop.f32.mrf.mxu0  ;;  %v1941_v40 = vpop.f32.mrf.mxu1 }
 0x609   : > { %v2412_v35 = vmul.f32 -1.442695, %v1944_v33  ;;  %v1945_v37 = vadd.f32 %v1870_v34, %v3951_v36  ;;  %v1947_v43 = vadd.f32 %v1941_v40, %v3952_v42 }
 0x60b   : > { %2648 = vpow2.f32 %v2412_v35  ;;  %v2413_v39 = vmul.f32 -1.442695, %v1945_v37  ;;  %v2414_v44 = vmul.f32 -1.442695, %v1947_v43 }
 0x60d   : > { %2650 = vpow2.f32 %v2413_v39 }
 0x60e   : > { %2652 = vpow2.f32 %v2414_v44 }
 0x618   : > { %v2649_v45 = vpop.eup %2648 }
 0x619   : > { %v1951_v49 = vadd.f32 1.0, %v2649_v45 }
 0x61a   : > { %v2651_v51 = vpop.eup %2650 }
 0x61b   : > { %2654 = vrcp.f32 %v1951_v49  ;;  %v1957_v60 = vadd.f32 1.0, %v2651_v51  ;;  %v2653_v59 = vpop.eup %2652 }
 0x61c   : > { %2656 = vtanh.f32 %v1946_v48  ;;  %v1964_v7 = vadd.f32 1.0, %v2653_v59 }
 0x61d   : > { %2658 = vrcp.f32 %v1957_v60 }
 0x61e   : > { %2660 = vrcp.f32 %v1964_v7 }
 0x626   : > { %v2498_v62 = vpop.f32.mrf.mxu0 }
 0x627   : > { %v2072_v23 = vadd.f32 %v2498_v62, %v2415_v32 }
 0x628   : > { %v2655_v4 = vpop.eup %2654  ;;  %v2066_v15 = vpop.f32.mrf.mxu0 }
 0x629   : > { %v2657_v3 = vpop.eup %2656  ;;  %v2067_v20 = vadd.f32 %v2415_v32, %v2066_v15  ;;  %v2096_v10 = vmax.f32 %v2072_v23, 0.0 }
 0x62a   : > { %v2659_v25 = vpop.eup %2658  ;;  %v2501_v13 = vpop.f32.mrf.mxu0  ;;  %v1968_v52 = vmul.f32 %v2657_v3, %v2655_v4 }
 0x62b   : > { %v1967_v47 = vmul.f32 %v2659_v25, %v3586_v19  ;;  %v2095_v11 = vmax.f32 %v2067_v20, 0.0  ;;  %v2082_v9 = vadd.f32 %v2501_v13, %v2415_v32  ;;  %v2661_v16 = vpop.eup %2660 }
 0x62c   : > { %v2076_v8 = vpop.f32.mrf.mxu0 }
 0x62d   : > { %v2077_v12 = vadd.f32 %v2415_v32, %v2076_v8  ;;  %2537 = vmatprep.mubr.f32.mxu1 %v2095_v11  ;;  %v1969_v53 = vadd.f32 %v1968_v52, %v1967_v47  ;;  %v2098_v19 = vmax.f32 %v2082_v9, 0.0 }
 0x62e   : > { %2538 = vmatmul.mubr.f32.vlgmr.msra.gmra.mxu1 %v2096_v10 }
 0x62f   : > { %v2097_v14 = vmax.f32 %v2077_v12, 0.0  ;;  %2662 = vtanh.f32 %v1969_v53  ;;  %2302 = vst [vmem:[%s3698_s7 + $0x38] sm:$0xff] %v1969_v53 }
 0x631   : > { %2540 = vmatprep.mubr.f32.mxu1 %v2097_v14 }
 0x632   : > { %2541 = vmatmul.mubr.f32.gmra.mxu1 %v2098_v19 }
 0x63c   : > { %v2663_v17 = vpop.eup %2662 }
 0x63d   : > { %v1971_v18 = vmul.f32 %v2663_v17, %v2661_v16 }
 0x63f   : > { %2503 = vmatmul.mubr.f32.gmra.mxu0 %v1971_v18  ;;  %2301 = vst [vmem:[%s3698_s7 + $0x30] sm:$0xff] %v1971_v18 }
 0x6ee   : > { %v2539_v57 = vpop.f32.mrf.mxu1 }
 0x6ef   : > { %v2194_v1 = vadd.f32 %v2539_v57, %v2416_v21 }
 0x6f0   : > { %v2188_v2 = vpop.f32.mrf.mxu1 }
 0x6f1   : > { %v2218_v0 = vmax.f32 %v2194_v1, 0.0  ;;  %v2189_v50 = vadd.f32 %v2416_v21, %v2188_v2 }
 0x6f2   : > { %v2542_v61 = vpop.f32.mrf.mxu1 }
 0x6f3   : > { %v2217_v41 = vmax.f32 %v2189_v50, 0.0  ;;  %v2204_v22 = vadd.f32 %v2542_v61, %v2416_v21  ;;  %v2224_v24 = vsel %vm534_vm0, %v2218_v0, -1e+30 }
 0x6f4   : > { %2231 = vmax.xlane.f32.xlu0 %v2224_v24  ;;  %v2198_v58 = vpop.f32.mrf.mxu1 }
 0x6f5   : > { %v2220_v63 = vmax.f32 %v2204_v22, 0.0  ;;  %v2199_v56 = vadd.f32 %v2416_v21, %v2198_v58  ;;  %v2223_v6 = vsel %vm534_vm0, %v2217_v41, -1e+30 }
 0x6f7   : > { %v2219_v54 = vmax.f32 %v2199_v56, 0.0  ;;  %v2226_v5 = vsel %vm534_vm0, %v2220_v63, -1e+30 }
 0x6f8   : > { %2235 = vmax.xlane.f32.xlu1 %v2226_v5  ;;  %2229 = vmax.xlane.f32.xlu0 %v2223_v6 }
 0x6f9   : > { %v2225_v26 = vsel %vm534_vm0, %v2219_v54, -1e+30 }
 0x6fc   : > { %2233 = vmax.xlane.f32.xlu1 %v2225_v26 }
 0x6ff   : > { %v2504_v27 = vpop.f32.mrf.mxu0 }
 0x700   : > { %v2092_v28 = vadd.f32 %v2504_v27, %v2415_v32 }
 0x701   : > { %v2086_v29 = vpop.f32.mrf.mxu0 }
 0x702   : > { %v2087_v30 = vadd.f32 %v2415_v32, %v2086_v29  ;;  %v2100_v33 = vmax.f32 %v2092_v28, 0.0 }
 0x704   : > { %v2099_v31 = vmax.f32 %v2087_v30, 0.0 }
 0x706   : > { %2543 = vmatprep.mubr.f32.mxu1 %v2099_v31 }
 0x707   : > { %2544 = vmatmul.mubr.f32.gmra.mxu1 %v2100_v33 }
 0x77d   : > { %v2232_v34 = vpop.xlane.xlu0 %2231 }
 0x77e   : > { %v3713_v37 = vsub.f32 %v2218_v0, %v2232_v34 }
 0x780   : > { %v2249_v40 = vmul.f32 1.442695, %v3713_v37 }
 0x781   : > { %v2236_v35 = vpop.xlane.xlu1 %2235  ;;  %v2230_v36 = vpop.xlane.xlu0 %2229 }
 0x782   : > { %v3715_v38 = vsub.f32 %v2217_v41, %v2230_v36  ;;  %v3718_v42 = vsub.f32 %v2220_v63, %v2236_v35  ;;  %2664 = vpow2.f32 %v2249_v40 }
 0x784   : > { %v2247_v43 = vmul.f32 1.442695, %v3715_v38  ;;  %v2253_v45 = vmul.f32 1.442695, %v3718_v42 }
 0x785   : > { %v2234_v39 = vpop.xlane.xlu1 %2233 }
 0x786   : > { %v3721_v44 = vsub.f32 %v2219_v54, %v2234_v39  ;;  %2666 = vpow2.f32 %v2247_v43 }
 0x787   : > { %2668 = vpow2.f32 %v2253_v45 }
 0x788   : > { %v2251_v46 = vmul.f32 1.442695, %v3721_v44 }
 0x78a   : > { %2670 = vpow2.f32 %v2251_v46 }
 0x78f   : > { %v2665_v4 = vpop.eup %2664 }
 0x790   : > { %v2260_v3 = vsel %vm534_vm0, %v2665_v4, 0.0 }
 0x793   : > { %v2667_v15 = vpop.eup %2666 }
 0x794   : > { %v2669_v20 = vpop.eup %2668  ;;  %v2259_v25 = vsel %vm534_vm0, %v2667_v15, 0.0 }
 0x795   : > { %v2262_v13 = vsel %vm534_vm0, %v2669_v20, 0.0 }
 0x797   : > { %v2671_v7 = vpop.eup %2670 }
 0x798   : > { %v2261_v52 = vsel %vm534_vm0, %v2671_v7, 0.0 }
 0x7c7   : > { %v2545_v48 = vpop.f32.mrf.mxu1 }
 0x7c8   : > { %v2214_v49 = vadd.f32 %v2545_v48, %v2416_v21 }
 0x7c9   : > { %v2208_v51 = vpop.f32.mrf.mxu1 }
 0x7ca   : > { %v2222_v60 = vmax.f32 %v2214_v49, 0.0  ;;  %v2209_v32 = vadd.f32 %v2416_v21, %v2208_v51 }
 0x7cc   : > { %v2221_v62 = vmax.f32 %v2209_v32, 0.0  ;;  %v2228_v59 = vsel %vm534_vm0, %v2222_v60, -1e+30 }
 0x7cd   : > { %2239 = vmax.xlane.f32.xlu1 %v2228_v59 }
 0x7ce   : > { %v2227_v23 = vsel %vm534_vm0, %v2221_v62, -1e+30 }
 0x7cf   : > { %2237 = vmax.xlane.f32.xlu0 %v2227_v23 }
 0x7d1   : > { %2267 = vadd.xlane.f32.xlu1 %v2260_v3 }
 0x7d3   : > { %2265 = vadd.xlane.f32.xlu0 %v2259_v25 }
 0x7d5   : > { %2271 = vadd.xlane.f32.xlu1 %v2262_v13 }
 0x7d7   : > { %2269 = vadd.xlane.f32.xlu0 %v2261_v52 }
 0x856   : > { %v2240_v47 = vpop.xlane.xlu1 %2239 }
 0x857   : > { %v2246_v11 = vsub.f32 %v2222_v60, %v2240_v47 }
 0x858   : > { %v2238_v10 = vpop.xlane.xlu0 %2237 }
 0x859   : > { %v2257_v9 = vmul.f32 1.442695, %v2246_v11  ;;  %v2245_v8 = vsub.f32 %v2221_v62, %v2238_v10 }
 0x85a   : > { %v2268_v12 = vpop.xlane.xlu1 %2267 }
 0x85b   : > { %2672 = vpow2.f32 %v2257_v9  ;;  %v2255_v53 = vmul.f32 1.442695, %v2245_v8 }
 0x85c   : > { %2674 = vlog2.f32 %v2268_v12  ;;  %v2266_v14 = vpop.xlane.xlu0 %2265 }
 0x85d   : > { %2676 = vpow2.f32 %v2255_v53 }
 0x85e   : > { %2678 = vlog2.f32 %v2266_v14  ;;  %v2272_v19 = vpop.xlane.xlu1 %2271 }
 0x85f   : > { %2680 = vlog2.f32 %v2272_v19 }
 0x860   : > { %v2270_v16 = vpop.xlane.xlu0 %2269 }
 0x861   : > { %2682 = vlog2.f32 %v2270_v16 }
 0x868   : > { %v2673_v17 = vpop.eup %2672 }
 0x869   : > { %v2675_v18 = vpop.eup %2674  ;;  %v2264_v21 = vsel %vm534_vm0, %v2673_v17, 0.0 }
 0x86a   : > { %v2677_v57 = vpop.eup %2676  ;;  %v2280_v1 = vmul.f32 0.6931472, %v2675_v18  ;;  %2275 = vadd.xlane.f32.xlu1 %v2264_v21 }
 0x86b   : > { %v2679_v2 = vpop.eup %2678  ;;  %v2263_v0 = vsel %vm534_vm0, %v2677_v57, 0.0 }
 0x86c   : > { %v2681_v50 = vpop.eup %2680  ;;  %v2290_v61 = vsub.f32 %v3713_v37, %v2280_v1  ;;  %v2278_v41 = vmul.f32 0.6931472, %v2679_v2  ;;  %2273 = vadd.xlane.f32.xlu0 %v2263_v0 }
 0x86d   : > { %v2284_v22 = vmul.f32 0.6931472, %v2681_v50 }
 0x86e   : > { %v2683_v24 = vpop.eup %2682  ;;  %2296 = vst [vmem:[%s3698_s7 + $0x8] sm:$0xff] %v2290_v61  ;;  %v2289_v58 = vsub.f32 %v3715_v38, %v2278_v41 }
 0x86f   : > { %v2292_v63 = vsub.f32 %v3718_v42, %v2284_v22  ;;  %v2282_v56 = vmul.f32 0.6931472, %v2683_v24 }
 0x870   : > { %2295 = vst [vmem:[%s3698_s7] sm:$0xff] %v2289_v58 }
 0x871   : > { %2298 = vst [vmem:[%s3698_s7 + $0x18] sm:$0xff] %v2292_v63  ;;  %v2291_v55 = vsub.f32 %v3721_v44, %v2282_v56 }
 0x873   : > { %2297 = vst [vmem:[%s3698_s7 + $0x10] sm:$0xff] %v2291_v55 }
 0x8f3   : > { %v2276_v54 = vpop.xlane.xlu1 %2275 }
 0x8f4   : > { %2684 = vlog2.f32 %v2276_v54 }
 0x8f5   : > { %v2274_v5 = vpop.xlane.xlu0 %2273 }
 0x8f6   : > { %2686 = vlog2.f32 %v2274_v5 }
 0x901   : > { %v2685_v6 = vpop.eup %2684 }
 0x902   : > { %v2288_v26 = vmul.f32 0.6931472, %v2685_v6 }
 0x903   : > { %v2687_v27 = vpop.eup %2686 }
 0x904   : > { %v2294_v28 = vsub.f32 %v2246_v11, %v2288_v26  ;;  %v2286_v29 = vmul.f32 0.6931472, %v2687_v27 }
 0x906   : > { %2300 = vst [vmem:[%s3698_s7 + $0x28] sm:$0xff] %v2294_v28  ;;  %v2293_v30 = vsub.f32 %v2245_v8, %v2286_v29 }
 0x908   : > { %2299 = vst [vmem:[%s3698_s7 + $0x20] sm:$0xff] %v2293_v30 }
 0x909 PF: > { %s15_s15 = sadd.s32 1, %s2724_s15  }
 0x90a   : > { %p12_p3 = scmp.ge.s32.totalorder %s15_s15, 4  }
 0x90c   :  { %14 = sbr.rel (!%p12_p3) target bundleno = 1 (0x1), region = 74 }
 0x911   :  { %2325 = vsyncpa [#allocation5], 1 }
 0x912   :  { %2327 = vsyncpa [#allocation5 + $0x1], 1 }

</bundles_post_ra>
